<compile_context>
chip_gen: v7x
topology: tpu7x:2x2x1
jax: 0.10.0
libtpu: 0.0.40
codegen_flags: <defaults>
</compile_context>

<pallas_src>
import jax
import jax.numpy as jnp
from jax.experimental import pallas as pl
from jax.experimental.pallas import tpu as pltpu

# ---------------- config (small synthetic ViT) ----------------
B = 2                 # batch
C = 3                 # image channels
IMG = 16              # image height = width
PATCH = 8             # patch size
D = 32                # hidden size
HEADS = 4
DH = D // HEADS
LAYERS = 2
FF = 4 * D            # transformer MLP intermediate
NUM_CLASSES = 10
NP = (IMG // PATCH) ** 2
SEQ = NP + 1          # +1 for CLS token
BS = B * SEQ          # all tokens, all batches
SW_H = 4 * D          # SwiGLU hidden size (classifier head)
PPX = C * PATCH * PATCH          # flattened patch pixels = 192
K_PAD = 256                      # padded embedding contraction dim (PPX+SEQ=197 -> 256)
CLS_PAD = 192                    # lane-padded logits width -> packed output is 256 wide
OUT_W = 2 * D + CLS_PAD          # packed output: [f_t | f_c | logits_pad] = 256
LN_EPS_VIT = 1e-12    # HF ViT layer_norm_eps
LN_EPS_HEAD = 1e-5    # torch.nn.LayerNorm default eps

# ---------------- packed small-vector slab layout ([VEC_ROWS, 256]) -----------
VEC_W = 256
VEC_PER_LAYER = 8                     # ln1_g, ln1_b, bqkv, bo, ln2_g, ln2_b, b_fc1, b_fc2
VEC_LNF = LAYERS * VEC_PER_LAYER      # 16..19: ln_f_g, ln_f_b, norm_g, norm_b
VEC_SWB12 = VEC_LNF + 4               # 20: SwiGLU b1|b2 (all 256 lanes)
VEC_SWB3 = VEC_LNF + 5                # 21: SwiGLU b3 (padded to CLS_PAD)
VEC_MASK = VEC_LNF + 6                # 22..22+BS-1: additive batch-block attention mask
VEC_ROWS = VEC_MASK + BS              # 32


# ---------------- fused kernel ----------------
def _layernorm(x, g, b, eps):
    mu = jnp.mean(x, axis=-1, keepdims=True)
    xc = x - mu
    var = jnp.mean(xc * xc, axis=-1, keepdims=True)
    return xc * jax.lax.rsqrt(var + eps) * g + b


def _vit_fused_kernel(
    tokens_ref,     # [BS, K_PAD]  pixels + one-hot position (zero-padded)
    emb_w_ref,      # [K_PAD, D]   patch_w rows | cls+pos0 | pos_j+patch_b
    w_attn_ref,     # [LAYERS, D, 4D]  qkv (0:3D) | wo (3D:4D)
    w_fc1_ref,      # [LAYERS, D, FF]
    w_fc2_ref,      # [LAYERS, FF, D]
    sw_w12_ref,     # [D, 2*SW_H]
    sw_w3_ref,      # [SW_H, CLS_PAD]
    vecs_ref,       # [VEC_ROWS, VEC_W]  all small vectors + attention mask
    out_ref,        # [B, OUT_W]   f_t | f_c | logits_pad
):
    f32 = jnp.float32

    def vrow(r, width):
        return vecs_ref[r:r + 1, :width]          # static slice -> [1, width]

    # ---- patch embed + CLS + positional embedding: ONE augmented matmul ----
    x = jnp.dot(tokens_ref[...], emb_w_ref[...], preferred_element_type=f32)  # [BS, D]

    # additive mask: 0 within a batch's token block, -1e30 across batches
    mask = vecs_ref[VEC_MASK:VEC_MASK + BS, :BS]                              # [BS, BS]

    scale = 1.0 / (DH ** 0.5)
    for l in range(LAYERS):
        base = l * VEC_PER_LAYER
        w_l = w_attn_ref[l]                                                   # [D, 4D]

        # ---- self-attention block (pre-LN), packed QKV, register-resident ----
        h_ln = _layernorm(x, vrow(base + 0, D), vrow(base + 1, D), LN_EPS_VIT)
        qkv = jnp.dot(h_ln, w_l[:, :3 * D],
                      preferred_element_type=f32) + vrow(base + 2, 3 * D)     # [BS, 3D]

        heads = []
        for h in range(HEADS):
            qh = qkv[:, 0 * D + h * DH:0 * D + (h + 1) * DH]
            kh = qkv[:, 1 * D + h * DH:1 * D + (h + 1) * DH]
            vh = qkv[:, 2 * D + h * DH:2 * D + (h + 1) * DH]
            s = jax.lax.dot_general(
                qh, kh, (((1,), (1,)), ((), ())),
                preferred_element_type=f32) * scale + mask                    # [BS, BS]
            s = s - jnp.max(s, axis=-1, keepdims=True)
            p = jnp.exp(s)
            p = p * pl.reciprocal(jnp.sum(p, axis=-1, keepdims=True), approx=True)
            heads.append(jnp.dot(p, vh, preferred_element_type=f32))          # [BS, DH]
        attn = jnp.concatenate(heads, axis=-1)                                # [BS, D]
        x = x + jnp.dot(attn, w_l[:, 3 * D:],
                        preferred_element_type=f32) + vrow(base + 3, D)

        # ---- MLP block (pre-LN, GELU) ----
        h_ln = _layernorm(x, vrow(base + 4, D), vrow(base + 5, D), LN_EPS_VIT)
        hmid = jnp.dot(h_ln, w_fc1_ref[l],
                       preferred_element_type=f32) + vrow(base + 6, FF)
        # TODO(synk): HF ViT uses exact (erf) GELU; tanh approximation is used
        # because erf lowering in Mosaic is not guaranteed.
        hmid = jax.nn.gelu(hmid, approximate=True)
        x = x + jnp.dot(hmid, w_fc2_ref[l],
                        preferred_element_type=f32) + vrow(base + 7, D)

    # ---- CLS pooling (LN is row-wise, so pool first, then LN only B rows) ----
    cls_rows = jnp.concatenate([x[b * SEQ:b * SEQ + 1, :] for b in range(B)], axis=0)
    f_t = _layernorm(cls_rows, vrow(VEC_LNF + 0, D), vrow(VEC_LNF + 1, D), LN_EPS_VIT)
    f_c = _layernorm(f_t, vrow(VEC_LNF + 2, D), vrow(VEC_LNF + 3, D), LN_EPS_HEAD)

    # ---- SwiGLU classifier head: packed [w1 | w2], lane-padded w3 ----
    h12 = jnp.dot(f_c, sw_w12_ref[...],
                  preferred_element_type=f32) + vrow(VEC_SWB12, 2 * SW_H)     # [B, 2*SW_H]
    a = h12[:, :SW_H]
    g = h12[:, SW_H:]
    hsw = (a * jax.nn.sigmoid(a)) * g                                         # SiLU(w1x)*(w2x)
    logits = jnp.dot(hsw, sw_w3_ref[...],
                     preferred_element_type=f32) + vrow(VEC_SWB3, CLS_PAD)    # [B, CLS_PAD]

    # ---- single lane-dense packed output store ----
    out_ref[...] = jnp.concatenate([f_t, f_c, logits], axis=-1)               # [B, 256]


# ---------------- wrapper ----------------
def _full_spec(shape):
    return pl.BlockSpec(shape, lambda *_: (0,) * len(shape))


@jax.jit
def vit_classifier_forward(pixel_values, params):
    b, c, hgt, wdt = pixel_values.shape
    nh, nw = hgt // PATCH, wdt // PATCH
    npatch = nh * nw
    # patch extraction + one-hot position columns are pure layout; done once in XLA.
    # NOTE: conv weight is flattened in (c, ph, pw) order — consistent with init_params.
    patches = pixel_values.reshape(b, c, nh, PATCH, nw, PATCH)
    patches = patches.transpose(0, 2, 4, 1, 3, 5).reshape(b, npatch, c * PATCH * PATCH)

    tokens = jnp.zeros((b, SEQ, K_PAD), jnp.float32)
    tokens = tokens.at[:, 1:, :PPX].set(patches)
    tokens = tokens.at[:, :, PPX:PPX + SEQ].set(
        jnp.broadcast_to(jnp.eye(SEQ, dtype=jnp.float32), (b, SEQ, SEQ)))
    tokens = tokens.reshape(b * SEQ, K_PAD)

    args = (
        tokens,
        params["emb_w"], params["w_attn"], params["w_fc1"], params["w_fc2"],
        params["sw_w12"], params["sw_w3"], params["vecs"],
    )

    packed = pl.pallas_call(
        _vit_fused_kernel,
        out_shape=jax.ShapeDtypeStruct((B, OUT_W), jnp.float32),
        grid=(1,),
        in_specs=[_full_spec(a.shape) for a in args],
        out_specs=_full_spec((B, OUT_W)),
        compiler_params=pltpu.CompilerParams(
            dimension_semantics=("arbitrary",)),
    )(*args)

    return {
        "f_t": packed[:, :D],
        "f_c": packed[:, D:2 * D],
        "cls": packed[:, 2 * D:2 * D + NUM_CLASSES],
    }


# ---------------- parameter init (deterministic, synthetic) ----------------
def init_params(key):
    def nrm(k, shape, scale=0.02):
        return scale * jax.random.normal(k, shape, dtype=jnp.float32)

    keys = iter(jax.random.split(key, 64))

    # raw (unpacked) parameters, mirroring the PyTorch module
    patch_w = nrm(next(keys), (PPX, D))            # conv kernel flattened (c, ph, pw)
    patch_b = nrm(next(keys), (1, D))
    cls_token = nrm(next(keys), (1, D))
    pos_emb = nrm(next(keys), (SEQ, D))
    ln1_g = jnp.ones((LAYERS, D), jnp.float32)
    ln1_b = jnp.zeros((LAYERS, D), jnp.float32)
    wqkv = nrm(next(keys), (LAYERS, D, 3 * D))
    bqkv = nrm(next(keys), (LAYERS, 3 * D))
    wo = nrm(next(keys), (LAYERS, D, D))
    bo = nrm(next(keys), (LAYERS, D))
    ln2_g = jnp.ones((LAYERS, D), jnp.float32)
    ln2_b = jnp.zeros((LAYERS, D), jnp.float32)
    w_fc1 = nrm(next(keys), (LAYERS, D, FF))
    b_fc1 = nrm(next(keys), (LAYERS, FF))
    w_fc2 = nrm(next(keys), (LAYERS, FF, D))
    b_fc2 = nrm(next(keys), (LAYERS, D))
    ln_f_g = jnp.ones((D,), jnp.float32)
    ln_f_b = jnp.zeros((D,), jnp.float32)
    norm_g = jnp.ones((D,), jnp.float32)
    norm_b = jnp.zeros((D,), jnp.float32)
    sw_w1 = nrm(next(keys), (D, SW_H))
    sw_b1 = nrm(next(keys), (SW_H,))
    sw_w2 = nrm(next(keys), (D, SW_H))
    sw_b2 = nrm(next(keys), (SW_H,))
    sw_w3 = nrm(next(keys), (SW_H, NUM_CLASSES))
    sw_b3 = nrm(next(keys), (NUM_CLASSES,))

    p = {}

    # augmented embedding weight: patch_w rows, then per-position rows so that
    # tokens @ emb_w == [cls+pos0 ; conv(patches)+patch_b+pos_j] exactly.
    emb_w = jnp.zeros((K_PAD, D), jnp.float32)
    emb_w = emb_w.at[:PPX, :].set(patch_w)
    emb_w = emb_w.at[PPX, :].set(cls_token[0] + pos_emb[0])
    emb_w = emb_w.at[PPX + 1:PPX + SEQ, :].set(pos_emb[1:] + patch_b)
    p["emb_w"] = emb_w

    # packed attention weight [qkv | wo] -> lane-dense 128 wide per layer
    p["w_attn"] = jnp.concatenate([wqkv, wo], axis=-1)          # [L, D, 4D]
    p["w_fc1"] = w_fc1
    p["w_fc2"] = w_fc2

    # SwiGLU classifier: w1/w2 packed to [D, 2*SW_H]; w3 zero-padded to CLS_PAD lanes
    p["sw_w12"] = jnp.concatenate([sw_w1, sw_w2], axis=-1)
    p["sw_w3"] = jnp.zeros((SW_H, CLS_PAD), jnp.float32).at[:, :NUM_CLASSES].set(sw_w3)

    # one lane-dense slab for every small vector + the attention batch mask
    vecs = jnp.zeros((VEC_ROWS, VEC_W), jnp.float32)
    for l in range(LAYERS):
        base = l * VEC_PER_LAYER
        vecs = vecs.at[base + 0, :D].set(ln1_g[l])
        vecs = vecs.at[base + 1, :D].set(ln1_b[l])
        vecs = vecs.at[base + 2, :3 * D].set(bqkv[l])
        vecs = vecs.at[base + 3, :D].set(bo[l])
        vecs = vecs.at[base + 4, :D].set(ln2_g[l])
        vecs = vecs.at[base + 5, :D].set(ln2_b[l])
        vecs = vecs.at[base + 6, :FF].set(b_fc1[l])
        vecs = vecs.at[base + 7, :D].set(b_fc2[l])
    vecs = vecs.at[VEC_LNF + 0, :D].set(ln_f_g)
    vecs = vecs.at[VEC_LNF + 1, :D].set(ln_f_b)
    vecs = vecs.at[VEC_LNF + 2, :D].set(norm_g)
    vecs = vecs.at[VEC_LNF + 3, :D].set(norm_b)
    vecs = vecs.at[VEC_SWB12, :2 * SW_H].set(jnp.concatenate([sw_b1, sw_b2]))
    vecs = vecs.at[VEC_SWB3, :NUM_CLASSES].set(sw_b3)
    # additive attention mask: 0 within a batch's SEQ-token block, -1e30 across batches
    bid = jnp.arange(BS) // SEQ
    mask = jnp.where(bid[:, None] == bid[None, :], 0.0, -1e30).astype(jnp.float32)
    vecs = vecs.at[VEC_MASK:VEC_MASK + BS, :BS].set(mask)
    p["vecs"] = vecs
    return p


if __name__ == "__main__":
    key = jax.random.PRNGKey(0)
    k_param, k_input = jax.random.split(key)
    params = init_params(k_param)
    pixel_values = jax.random.normal(k_input, (B, C, IMG, IMG), dtype=jnp.float32)  # NCHW

    out = vit_classifier_forward(pixel_values, params)
    out = jax.tree_util.tree_map(jax.block_until_ready, out)

    assert out["f_t"].shape == (B, D)
    assert out["f_c"].shape == (B, D)
    assert out["cls"].shape == (B, NUM_CLASSES)
    print("KERNEL_OK")
</pallas_src>

<mosaic_0001>
module attributes {stable_mosaic.version = 11 : i64} {
  func.func @_vit_fused_kernel(%arg0: i32, %arg1: memref<10x256xf32, #tpu.memory_space<vmem>>, %arg2: memref<256x32xf32, #tpu.memory_space<vmem>>, %arg3: memref<2x32x128xf32, #tpu.memory_space<vmem>>, %arg4: memref<2x32x128xf32, #tpu.memory_space<vmem>>, %arg5: memref<2x128x32xf32, #tpu.memory_space<vmem>>, %arg6: memref<32x256xf32, #tpu.memory_space<vmem>>, %arg7: memref<128x192xf32, #tpu.memory_space<vmem>>, %arg8: memref<32x256xf32, #tpu.memory_space<vmem>>, %arg9: memref<2x256xf32, #tpu.memory_space<vmem>>) attributes {dimension_semantics = [#tpu.dimension_semantics<arbitrary>], iteration_bounds = array<i64: 1>, scalar_prefetch = 0 : i64, scratch_operands = 0 : i64, tpu.core_type = #tpu.core_type<tc>, window_params = [{pipeline_mode = #tpu.pipeline_mode<synchronous>, transform_indices = @transform_0, window_bounds = array<i64: 10, 256>}, {pipeline_mode = #tpu.pipeline_mode<synchronous>, transform_indices = @transform_1, window_bounds = array<i64: 256, 32>}, {pipeline_mode = #tpu.pipeline_mode<synchronous>, transform_indices = @transform_2, window_bounds = array<i64: 2, 32, 128>}, {pipeline_mode = #tpu.pipeline_mode<synchronous>, transform_indices = @transform_3, window_bounds = array<i64: 2, 32, 128>}, {pipeline_mode = #tpu.pipeline_mode<synchronous>, transform_indices = @transform_4, window_bounds = array<i64: 2, 128, 32>}, {pipeline_mode = #tpu.pipeline_mode<synchronous>, transform_indices = @transform_5, window_bounds = array<i64: 32, 256>}, {pipeline_mode = #tpu.pipeline_mode<synchronous>, transform_indices = @transform_6, window_bounds = array<i64: 128, 192>}, {pipeline_mode = #tpu.pipeline_mode<synchronous>, transform_indices = @transform_7, window_bounds = array<i64: 32, 256>}, {pipeline_mode = #tpu.pipeline_mode<synchronous>, transform_indices = @transform_8, window_bounds = array<i64: 2, 256>}]} {
    %c0 = arith.constant 0 : index
    %c0_0 = arith.constant 0 : index
    %0 = vector.load %arg1[%c0, %c0_0] : memref<10x256xf32, #tpu.memory_space<vmem>>, vector<10x256xf32>
    %c0_1 = arith.constant 0 : index
    %c0_2 = arith.constant 0 : index
    %1 = vector.load %arg2[%c0_1, %c0_2] : memref<256x32xf32, #tpu.memory_space<vmem>>, vector<256x32xf32>
    %cst = arith.constant dense<0.000000e+00> : vector<10x32xf32>
    %2 = tpu.matmul %0, %1, %cst {dimension_numbers = #tpu.dot_dimension_numbers<[1], [0], [0], [1], [0, 0, 1, 1], [], []>} : vector<10x256xf32>, vector<256x32xf32>, vector<10x32xf32> -> vector<10x32xf32>
    %c22 = arith.constant 22 : index
    %c0_3 = arith.constant 0 : index
    %3 = vector.load %arg8[%c22, %c0_3] : memref<32x256xf32, #tpu.memory_space<vmem>>, vector<10x10xf32>
    %c0_4 = arith.constant 0 : index
    %c0_5 = arith.constant 0 : index
    %c0_6 = arith.constant 0 : index
    %4 = vector.load %arg3[%c0_4, %c0_5, %c0_6] : memref<2x32x128xf32, #tpu.memory_space<vmem>>, vector<1x32x128xf32>
    %5 = vector.shape_cast %4 : vector<1x32x128xf32> to vector<32x128xf32>
    %c0_7 = arith.constant 0 : index
    %c0_8 = arith.constant 0 : index
    %6 = vector.load %arg8[%c0_7, %c0_8] : memref<32x256xf32, #tpu.memory_space<vmem>>, vector<1x32xf32>
    %c1 = arith.constant 1 : index
    %c0_9 = arith.constant 0 : index
    %7 = vector.load %arg8[%c1, %c0_9] : memref<32x256xf32, #tpu.memory_space<vmem>>, vector<1x32xf32>
    %cst_10 = arith.constant dense<0.000000e+00> : vector<10xf32>
    %8 = vector.multi_reduction <add>, %2, %cst_10 [1] : vector<10x32xf32> to vector<10xf32>
    %9 = vector.shape_cast %8 : vector<10xf32> to vector<10x1xf32>
    %cst_11 = arith.constant 3.200000e+01 : f32
    %10 = vector.broadcast %cst_11 : f32 to vector<10x1xf32>
    %11 = arith.divf %9, %10 : vector<10x1xf32>
    %12 = vector.broadcast %11 : vector<10x1xf32> to vector<10x32xf32>
    %13 = arith.subf %2, %12 : vector<10x32xf32>
    %14 = arith.mulf %13, %13 : vector<10x32xf32>
    %cst_12 = arith.constant dense<0.000000e+00> : vector<10xf32>
    %15 = vector.multi_reduction <add>, %14, %cst_12 [1] : vector<10x32xf32> to vector<10xf32>
    %16 = vector.shape_cast %15 : vector<10xf32> to vector<10x1xf32>
    %cst_13 = arith.constant 3.200000e+01 : f32
    %17 = vector.broadcast %cst_13 : f32 to vector<10x1xf32>
    %18 = arith.divf %16, %17 : vector<10x1xf32>
    %cst_14 = arith.constant 9.99999996E-13 : f32
    %19 = vector.broadcast %cst_14 : f32 to vector<10x1xf32>
    %20 = arith.addf %18, %19 : vector<10x1xf32>
    %21 = math.rsqrt %20 : vector<10x1xf32>
    %22 = vector.broadcast %21 : vector<10x1xf32> to vector<10x32xf32>
    %23 = arith.mulf %13, %22 : vector<10x32xf32>
    %24 = vector.broadcast %6 : vector<1x32xf32> to vector<10x32xf32>
    %25 = arith.mulf %23, %24 : vector<10x32xf32>
    %26 = vector.broadcast %7 : vector<1x32xf32> to vector<10x32xf32>
    %27 = arith.addf %25, %26 : vector<10x32xf32>
    %28 = vector.extract_strided_slice %5 {offsets = [0, 0], sizes = [32, 96], strides = [1, 1]} : vector<32x128xf32> to vector<32x96xf32>
    %cst_15 = arith.constant dense<0.000000e+00> : vector<10x96xf32>
    %29 = tpu.matmul %27, %28, %cst_15 {dimension_numbers = #tpu.dot_dimension_numbers<[1], [0], [0], [1], [0, 0, 1, 1], [], []>} : vector<10x32xf32>, vector<32x96xf32>, vector<10x96xf32> -> vector<10x96xf32>
    %c2 = arith.constant 2 : index
    %c0_16 = arith.constant 0 : index
    %30 = vector.load %arg8[%c2, %c0_16] : memref<32x256xf32, #tpu.memory_space<vmem>>, vector<1x96xf32>
    %31 = vector.broadcast %30 : vector<1x96xf32> to vector<10x96xf32>
    %32 = arith.addf %29, %31 : vector<10x96xf32>
    %33 = vector.extract_strided_slice %32 {offsets = [0, 0], sizes = [10, 8], strides = [1, 1]} : vector<10x96xf32> to vector<10x8xf32>
    %34 = vector.extract_strided_slice %32 {offsets = [0, 32], sizes = [10, 8], strides = [1, 1]} : vector<10x96xf32> to vector<10x8xf32>
    %35 = vector.extract_strided_slice %32 {offsets = [0, 64], sizes = [10, 8], strides = [1, 1]} : vector<10x96xf32> to vector<10x8xf32>
    %cst_17 = arith.constant dense<0.000000e+00> : vector<10x10xf32>
    %36 = tpu.matmul %33, %34, %cst_17 {dimension_numbers = #tpu.dot_dimension_numbers<[1], [1], [0], [0], [0, 0, 1, 0], [], []>} : vector<10x8xf32>, vector<10x8xf32>, vector<10x10xf32> -> vector<10x10xf32>
    %cst_18 = arith.constant 0.353553385 : f32
    %37 = vector.broadcast %cst_18 : f32 to vector<10x10xf32>
    %38 = arith.mulf %36, %37 : vector<10x10xf32>
    %39 = arith.addf %38, %3 : vector<10x10xf32>
    %cst_19 = arith.constant dense<0xFF800000> : vector<10xf32>
    %40 = vector.multi_reduction <maximumf>, %39, %cst_19 [1] : vector<10x10xf32> to vector<10xf32>
    %41 = vector.shape_cast %40 : vector<10xf32> to vector<10x1xf32>
    %42 = vector.broadcast %41 : vector<10x1xf32> to vector<10x10xf32>
    %43 = arith.subf %39, %42 : vector<10x10xf32>
    %44 = math.exp %43 : vector<10x10xf32>
    %cst_20 = arith.constant dense<0.000000e+00> : vector<10xf32>
    %45 = vector.multi_reduction <add>, %44, %cst_20 [1] : vector<10x10xf32> to vector<10xf32>
    %46 = vector.shape_cast %45 : vector<10xf32> to vector<10x1xf32>
    %47 = tpu.reciprocal %46 {approx = true} : vector<10x1xf32> -> vector<10x1xf32>
    %48 = vector.broadcast %47 : vector<10x1xf32> to vector<10x10xf32>
    %49 = arith.mulf %44, %48 : vector<10x10xf32>
    %cst_21 = arith.constant dense<0.000000e+00> : vector<10x8xf32>
    %50 = tpu.matmul %49, %35, %cst_21 {dimension_numbers = #tpu.dot_dimension_numbers<[1], [0], [0], [1], [0, 0, 1, 1], [], []>} : vector<10x10xf32>, vector<10x8xf32>, vector<10x8xf32> -> vector<10x8xf32>
    %51 = vector.extract_strided_slice %32 {offsets = [0, 8], sizes = [10, 8], strides = [1, 1]} : vector<10x96xf32> to vector<10x8xf32>
    %52 = vector.extract_strided_slice %32 {offsets = [0, 40], sizes = [10, 8], strides = [1, 1]} : vector<10x96xf32> to vector<10x8xf32>
    %53 = vector.extract_strided_slice %32 {offsets = [0, 72], sizes = [10, 8], strides = [1, 1]} : vector<10x96xf32> to vector<10x8xf32>
    %cst_22 = arith.constant dense<0.000000e+00> : vector<10x10xf32>
    %54 = tpu.matmul %51, %52, %cst_22 {dimension_numbers = #tpu.dot_dimension_numbers<[1], [1], [0], [0], [0, 0, 1, 0], [], []>} : vector<10x8xf32>, vector<10x8xf32>, vector<10x10xf32> -> vector<10x10xf32>
    %cst_23 = arith.constant 0.353553385 : f32
    %55 = vector.broadcast %cst_23 : f32 to vector<10x10xf32>
    %56 = arith.mulf %54, %55 : vector<10x10xf32>
    %57 = arith.addf %56, %3 : vector<10x10xf32>
    %cst_24 = arith.constant dense<0xFF800000> : vector<10xf32>
    %58 = vector.multi_reduction <maximumf>, %57, %cst_24 [1] : vector<10x10xf32> to vector<10xf32>
    %59 = vector.shape_cast %58 : vector<10xf32> to vector<10x1xf32>
    %60 = vector.broadcast %59 : vector<10x1xf32> to vector<10x10xf32>
    %61 = arith.subf %57, %60 : vector<10x10xf32>
    %62 = math.exp %61 : vector<10x10xf32>
    %cst_25 = arith.constant dense<0.000000e+00> : vector<10xf32>
    %63 = vector.multi_reduction <add>, %62, %cst_25 [1] : vector<10x10xf32> to vector<10xf32>
    %64 = vector.shape_cast %63 : vector<10xf32> to vector<10x1xf32>
    %65 = tpu.reciprocal %64 {approx = true} : vector<10x1xf32> -> vector<10x1xf32>
    %66 = vector.broadcast %65 : vector<10x1xf32> to vector<10x10xf32>
    %67 = arith.mulf %62, %66 : vector<10x10xf32>
    %cst_26 = arith.constant dense<0.000000e+00> : vector<10x8xf32>
    %68 = tpu.matmul %67, %53, %cst_26 {dimension_numbers = #tpu.dot_dimension_numbers<[1], [0], [0], [1], [0, 0, 1, 1], [], []>} : vector<10x10xf32>, vector<10x8xf32>, vector<10x8xf32> -> vector<10x8xf32>
    %69 = vector.extract_strided_slice %32 {offsets = [0, 16], sizes = [10, 8], strides = [1, 1]} : vector<10x96xf32> to vector<10x8xf32>
    %70 = vector.extract_strided_slice %32 {offsets = [0, 48], sizes = [10, 8], strides = [1, 1]} : vector<10x96xf32> to vector<10x8xf32>
    %71 = vector.extract_strided_slice %32 {offsets = [0, 80], sizes = [10, 8], strides = [1, 1]} : vector<10x96xf32> to vector<10x8xf32>
    %cst_27 = arith.constant dense<0.000000e+00> : vector<10x10xf32>
    %72 = tpu.matmul %69, %70, %cst_27 {dimension_numbers = #tpu.dot_dimension_numbers<[1], [1], [0], [0], [0, 0, 1, 0], [], []>} : vector<10x8xf32>, vector<10x8xf32>, vector<10x10xf32> -> vector<10x10xf32>
    %cst_28 = arith.constant 0.353553385 : f32
    %73 = vector.broadcast %cst_28 : f32 to vector<10x10xf32>
    %74 = arith.mulf %72, %73 : vector<10x10xf32>
    %75 = arith.addf %74, %3 : vector<10x10xf32>
    %cst_29 = arith.constant dense<0xFF800000> : vector<10xf32>
    %76 = vector.multi_reduction <maximumf>, %75, %cst_29 [1] : vector<10x10xf32> to vector<10xf32>
    %77 = vector.shape_cast %76 : vector<10xf32> to vector<10x1xf32>
    %78 = vector.broadcast %77 : vector<10x1xf32> to vector<10x10xf32>
    %79 = arith.subf %75, %78 : vector<10x10xf32>
    %80 = math.exp %79 : vector<10x10xf32>
    %cst_30 = arith.constant dense<0.000000e+00> : vector<10xf32>
    %81 = vector.multi_reduction <add>, %80, %cst_30 [1] : vector<10x10xf32> to vector<10xf32>
    %82 = vector.shape_cast %81 : vector<10xf32> to vector<10x1xf32>
    %83 = tpu.reciprocal %82 {approx = true} : vector<10x1xf32> -> vector<10x1xf32>
    %84 = vector.broadcast %83 : vector<10x1xf32> to vector<10x10xf32>
    %85 = arith.mulf %80, %84 : vector<10x10xf32>
    %cst_31 = arith.constant dense<0.000000e+00> : vector<10x8xf32>
    %86 = tpu.matmul %85, %71, %cst_31 {dimension_numbers = #tpu.dot_dimension_numbers<[1], [0], [0], [1], [0, 0, 1, 1], [], []>} : vector<10x10xf32>, vector<10x8xf32>, vector<10x8xf32> -> vector<10x8xf32>
    %87 = vector.extract_strided_slice %32 {offsets = [0, 24], sizes = [10, 8], strides = [1, 1]} : vector<10x96xf32> to vector<10x8xf32>
    %88 = vector.extract_strided_slice %32 {offsets = [0, 56], sizes = [10, 8], strides = [1, 1]} : vector<10x96xf32> to vector<10x8xf32>
    %89 = vector.extract_strided_slice %32 {offsets = [0, 88], sizes = [10, 8], strides = [1, 1]} : vector<10x96xf32> to vector<10x8xf32>
    %cst_32 = arith.constant dense<0.000000e+00> : vector<10x10xf32>
    %90 = tpu.matmul %87, %88, %cst_32 {dimension_numbers = #tpu.dot_dimension_numbers<[1], [1], [0], [0], [0, 0, 1, 0], [], []>} : vector<10x8xf32>, vector<10x8xf32>, vector<10x10xf32> -> vector<10x10xf32>
    %cst_33 = arith.constant 0.353553385 : f32
    %91 = vector.broadcast %cst_33 : f32 to vector<10x10xf32>
    %92 = arith.mulf %90, %91 : vector<10x10xf32>
    %93 = arith.addf %92, %3 : vector<10x10xf32>
    %cst_34 = arith.constant dense<0xFF800000> : vector<10xf32>
    %94 = vector.multi_reduction <maximumf>, %93, %cst_34 [1] : vector<10x10xf32> to vector<10xf32>
    %95 = vector.shape_cast %94 : vector<10xf32> to vector<10x1xf32>
    %96 = vector.broadcast %95 : vector<10x1xf32> to vector<10x10xf32>
    %97 = arith.subf %93, %96 : vector<10x10xf32>
    %98 = math.exp %97 : vector<10x10xf32>
    %cst_35 = arith.constant dense<0.000000e+00> : vector<10xf32>
    %99 = vector.multi_reduction <add>, %98, %cst_35 [1] : vector<10x10xf32> to vector<10xf32>
    %100 = vector.shape_cast %99 : vector<10xf32> to vector<10x1xf32>
    %101 = tpu.reciprocal %100 {approx = true} : vector<10x1xf32> -> vector<10x1xf32>
    %102 = vector.broadcast %101 : vector<10x1xf32> to vector<10x10xf32>
    %103 = arith.mulf %98, %102 : vector<10x10xf32>
    %cst_36 = arith.constant dense<0.000000e+00> : vector<10x8xf32>
    %104 = tpu.matmul %103, %89, %cst_36 {dimension_numbers = #tpu.dot_dimension_numbers<[1], [0], [0], [1], [0, 0, 1, 1], [], []>} : vector<10x10xf32>, vector<10x8xf32>, vector<10x8xf32> -> vector<10x8xf32>
    %105 = tpu.concatenate %50, %68, %86, %104 in 1 : vector<10x8xf32>, vector<10x8xf32>, vector<10x8xf32>, vector<10x8xf32> -> vector<10x32xf32>
    %106 = vector.extract_strided_slice %5 {offsets = [0, 96], sizes = [32, 32], strides = [1, 1]} : vector<32x128xf32> to vector<32x32xf32>
    %cst_37 = arith.constant dense<0.000000e+00> : vector<10x32xf32>
    %107 = tpu.matmul %105, %106, %cst_37 {dimension_numbers = #tpu.dot_dimension_numbers<[1], [0], [0], [1], [0, 0, 1, 1], [], []>} : vector<10x32xf32>, vector<32x32xf32>, vector<10x32xf32> -> vector<10x32xf32>
    %108 = arith.addf %2, %107 : vector<10x32xf32>
    %c3 = arith.constant 3 : index
    %c0_38 = arith.constant 0 : index
    %109 = vector.load %arg8[%c3, %c0_38] : memref<32x256xf32, #tpu.memory_space<vmem>>, vector<1x32xf32>
    %110 = vector.broadcast %109 : vector<1x32xf32> to vector<10x32xf32>
    %111 = arith.addf %108, %110 : vector<10x32xf32>
    %c4 = arith.constant 4 : index
    %c0_39 = arith.constant 0 : index
    %112 = vector.load %arg8[%c4, %c0_39] : memref<32x256xf32, #tpu.memory_space<vmem>>, vector<1x32xf32>
    %c5 = arith.constant 5 : index
    %c0_40 = arith.constant 0 : index
    %113 = vector.load %arg8[%c5, %c0_40] : memref<32x256xf32, #tpu.memory_space<vmem>>, vector<1x32xf32>
    %cst_41 = arith.constant dense<0.000000e+00> : vector<10xf32>
    %114 = vector.multi_reduction <add>, %111, %cst_41 [1] : vector<10x32xf32> to vector<10xf32>
    %115 = vector.shape_cast %114 : vector<10xf32> to vector<10x1xf32>
    %cst_42 = arith.constant 3.200000e+01 : f32
    %116 = vector.broadcast %cst_42 : f32 to vector<10x1xf32>
    %117 = arith.divf %115, %116 : vector<10x1xf32>
    %118 = vector.broadcast %117 : vector<10x1xf32> to vector<10x32xf32>
    %119 = arith.subf %111, %118 : vector<10x32xf32>
    %120 = arith.mulf %119, %119 : vector<10x32xf32>
    %cst_43 = arith.constant dense<0.000000e+00> : vector<10xf32>
    %121 = vector.multi_reduction <add>, %120, %cst_43 [1] : vector<10x32xf32> to vector<10xf32>
    %122 = vector.shape_cast %121 : vector<10xf32> to vector<10x1xf32>
    %cst_44 = arith.constant 3.200000e+01 : f32
    %123 = vector.broadcast %cst_44 : f32 to vector<10x1xf32>
    %124 = arith.divf %122, %123 : vector<10x1xf32>
    %cst_45 = arith.constant 9.99999996E-13 : f32
    %125 = vector.broadcast %cst_45 : f32 to vector<10x1xf32>
    %126 = arith.addf %124, %125 : vector<10x1xf32>
    %127 = math.rsqrt %126 : vector<10x1xf32>
    %128 = vector.broadcast %127 : vector<10x1xf32> to vector<10x32xf32>
    %129 = arith.mulf %119, %128 : vector<10x32xf32>
    %130 = vector.broadcast %112 : vector<1x32xf32> to vector<10x32xf32>
    %131 = arith.mulf %129, %130 : vector<10x32xf32>
    %132 = vector.broadcast %113 : vector<1x32xf32> to vector<10x32xf32>
    %133 = arith.addf %131, %132 : vector<10x32xf32>
    %c0_46 = arith.constant 0 : index
    %c0_47 = arith.constant 0 : index
    %c0_48 = arith.constant 0 : index
    %134 = vector.load %arg4[%c0_46, %c0_47, %c0_48] : memref<2x32x128xf32, #tpu.memory_space<vmem>>, vector<1x32x128xf32>
    %135 = vector.shape_cast %134 : vector<1x32x128xf32> to vector<32x128xf32>
    %cst_49 = arith.constant dense<0.000000e+00> : vector<10x128xf32>
    %136 = tpu.matmul %133, %135, %cst_49 {dimension_numbers = #tpu.dot_dimension_numbers<[1], [0], [0], [1], [0, 0, 1, 1], [], []>} : vector<10x32xf32>, vector<32x128xf32>, vector<10x128xf32> -> vector<10x128xf32>
    %c6 = arith.constant 6 : index
    %c0_50 = arith.constant 0 : index
    %137 = vector.load %arg8[%c6, %c0_50] : memref<32x256xf32, #tpu.memory_space<vmem>>, vector<1x128xf32>
    %138 = vector.broadcast %137 : vector<1x128xf32> to vector<10x128xf32>
    %139 = arith.addf %136, %138 : vector<10x128xf32>
    %140 = arith.mulf %139, %139 : vector<10x128xf32>
    %141 = arith.mulf %139, %140 : vector<10x128xf32>
    %cst_51 = arith.constant 4.471500e-02 : f32
    %142 = vector.broadcast %cst_51 : f32 to vector<10x128xf32>
    %143 = arith.mulf %142, %141 : vector<10x128xf32>
    %144 = arith.addf %139, %143 : vector<10x128xf32>
    %cst_52 = arith.constant 0.797884583 : f32
    %145 = vector.broadcast %cst_52 : f32 to vector<10x128xf32>
    %146 = arith.mulf %145, %144 : vector<10x128xf32>
    %147 = math.tanh %146 : vector<10x128xf32>
    %cst_53 = arith.constant 1.000000e+00 : f32
    %148 = vector.broadcast %cst_53 : f32 to vector<10x128xf32>
    %149 = arith.addf %148, %147 : vector<10x128xf32>
    %cst_54 = arith.constant 5.000000e-01 : f32
    %150 = vector.broadcast %cst_54 : f32 to vector<10x128xf32>
    %151 = arith.mulf %150, %149 : vector<10x128xf32>
    %152 = arith.mulf %139, %151 : vector<10x128xf32>
    %c0_55 = arith.constant 0 : index
    %c0_56 = arith.constant 0 : index
    %c0_57 = arith.constant 0 : index
    %153 = vector.load %arg5[%c0_55, %c0_56, %c0_57] : memref<2x128x32xf32, #tpu.memory_space<vmem>>, vector<1x128x32xf32>
    %154 = vector.shape_cast %153 : vector<1x128x32xf32> to vector<128x32xf32>
    %cst_58 = arith.constant dense<0.000000e+00> : vector<10x32xf32>
    %155 = tpu.matmul %152, %154, %cst_58 {dimension_numbers = #tpu.dot_dimension_numbers<[1], [0], [0], [1], [0, 0, 1, 1], [], []>} : vector<10x128xf32>, vector<128x32xf32>, vector<10x32xf32> -> vector<10x32xf32>
    %156 = arith.addf %111, %155 : vector<10x32xf32>
    %c7 = arith.constant 7 : index
    %c0_59 = arith.constant 0 : index
    %157 = vector.load %arg8[%c7, %c0_59] : memref<32x256xf32, #tpu.memory_space<vmem>>, vector<1x32xf32>
    %158 = vector.broadcast %157 : vector<1x32xf32> to vector<10x32xf32>
    %159 = arith.addf %156, %158 : vector<10x32xf32>
    %c1_60 = arith.constant 1 : index
    %c0_61 = arith.constant 0 : index
    %c0_62 = arith.constant 0 : index
    %160 = vector.load %arg3[%c1_60, %c0_61, %c0_62] : memref<2x32x128xf32, #tpu.memory_space<vmem>>, vector<1x32x128xf32>
    %161 = vector.shape_cast %160 : vector<1x32x128xf32> to vector<32x128xf32>
    %c8 = arith.constant 8 : index
    %c0_63 = arith.constant 0 : index
    %162 = vector.load %arg8[%c8, %c0_63] : memref<32x256xf32, #tpu.memory_space<vmem>>, vector<1x32xf32>
    %c9 = arith.constant 9 : index
    %c0_64 = arith.constant 0 : index
    %163 = vector.load %arg8[%c9, %c0_64] : memref<32x256xf32, #tpu.memory_space<vmem>>, vector<1x32xf32>
    %cst_65 = arith.constant dense<0.000000e+00> : vector<10xf32>
    %164 = vector.multi_reduction <add>, %159, %cst_65 [1] : vector<10x32xf32> to vector<10xf32>
    %165 = vector.shape_cast %164 : vector<10xf32> to vector<10x1xf32>
    %cst_66 = arith.constant 3.200000e+01 : f32
    %166 = vector.broadcast %cst_66 : f32 to vector<10x1xf32>
    %167 = arith.divf %165, %166 : vector<10x1xf32>
    %168 = vector.broadcast %167 : vector<10x1xf32> to vector<10x32xf32>
    %169 = arith.subf %159, %168 : vector<10x32xf32>
    %170 = arith.mulf %169, %169 : vector<10x32xf32>
    %cst_67 = arith.constant dense<0.000000e+00> : vector<10xf32>
    %171 = vector.multi_reduction <add>, %170, %cst_67 [1] : vector<10x32xf32> to vector<10xf32>
    %172 = vector.shape_cast %171 : vector<10xf32> to vector<10x1xf32>
    %cst_68 = arith.constant 3.200000e+01 : f32
    %173 = vector.broadcast %cst_68 : f32 to vector<10x1xf32>
    %174 = arith.divf %172, %173 : vector<10x1xf32>
    %cst_69 = arith.constant 9.99999996E-13 : f32
    %175 = vector.broadcast %cst_69 : f32 to vector<10x1xf32>
    %176 = arith.addf %174, %175 : vector<10x1xf32>
    %177 = math.rsqrt %176 : vector<10x1xf32>
    %178 = vector.broadcast %177 : vector<10x1xf32> to vector<10x32xf32>
    %179 = arith.mulf %169, %178 : vector<10x32xf32>
    %180 = vector.broadcast %162 : vector<1x32xf32> to vector<10x32xf32>
    %181 = arith.mulf %179, %180 : vector<10x32xf32>
    %182 = vector.broadcast %163 : vector<1x32xf32> to vector<10x32xf32>
    %183 = arith.addf %181, %182 : vector<10x32xf32>
    %184 = vector.extract_strided_slice %161 {offsets = [0, 0], sizes = [32, 96], strides = [1, 1]} : vector<32x128xf32> to vector<32x96xf32>
    %cst_70 = arith.constant dense<0.000000e+00> : vector<10x96xf32>
    %185 = tpu.matmul %183, %184, %cst_70 {dimension_numbers = #tpu.dot_dimension_numbers<[1], [0], [0], [1], [0, 0, 1, 1], [], []>} : vector<10x32xf32>, vector<32x96xf32>, vector<10x96xf32> -> vector<10x96xf32>
    %c10 = arith.constant 10 : index
    %c0_71 = arith.constant 0 : index
    %186 = vector.load %arg8[%c10, %c0_71] : memref<32x256xf32, #tpu.memory_space<vmem>>, vector<1x96xf32>
    %187 = vector.broadcast %186 : vector<1x96xf32> to vector<10x96xf32>
    %188 = arith.addf %185, %187 : vector<10x96xf32>
    %189 = vector.extract_strided_slice %188 {offsets = [0, 0], sizes = [10, 8], strides = [1, 1]} : vector<10x96xf32> to vector<10x8xf32>
    %190 = vector.extract_strided_slice %188 {offsets = [0, 32], sizes = [10, 8], strides = [1, 1]} : vector<10x96xf32> to vector<10x8xf32>
    %191 = vector.extract_strided_slice %188 {offsets = [0, 64], sizes = [10, 8], strides = [1, 1]} : vector<10x96xf32> to vector<10x8xf32>
    %cst_72 = arith.constant dense<0.000000e+00> : vector<10x10xf32>
    %192 = tpu.matmul %189, %190, %cst_72 {dimension_numbers = #tpu.dot_dimension_numbers<[1], [1], [0], [0], [0, 0, 1, 0], [], []>} : vector<10x8xf32>, vector<10x8xf32>, vector<10x10xf32> -> vector<10x10xf32>
    %cst_73 = arith.constant 0.353553385 : f32
    %193 = vector.broadcast %cst_73 : f32 to vector<10x10xf32>
    %194 = arith.mulf %192, %193 : vector<10x10xf32>
    %195 = arith.addf %194, %3 : vector<10x10xf32>
    %cst_74 = arith.constant dense<0xFF800000> : vector<10xf32>
    %196 = vector.multi_reduction <maximumf>, %195, %cst_74 [1] : vector<10x10xf32> to vector<10xf32>
    %197 = vector.shape_cast %196 : vector<10xf32> to vector<10x1xf32>
    %198 = vector.broadcast %197 : vector<10x1xf32> to vector<10x10xf32>
    %199 = arith.subf %195, %198 : vector<10x10xf32>
    %200 = math.exp %199 : vector<10x10xf32>
    %cst_75 = arith.constant dense<0.000000e+00> : vector<10xf32>
    %201 = vector.multi_reduction <add>, %200, %cst_75 [1] : vector<10x10xf32> to vector<10xf32>
    %202 = vector.shape_cast %201 : vector<10xf32> to vector<10x1xf32>
    %203 = tpu.reciprocal %202 {approx = true} : vector<10x1xf32> -> vector<10x1xf32>
    %204 = vector.broadcast %203 : vector<10x1xf32> to vector<10x10xf32>
    %205 = arith.mulf %200, %204 : vector<10x10xf32>
    %cst_76 = arith.constant dense<0.000000e+00> : vector<10x8xf32>
    %206 = tpu.matmul %205, %191, %cst_76 {dimension_numbers = #tpu.dot_dimension_numbers<[1], [0], [0], [1], [0, 0, 1, 1], [], []>} : vector<10x10xf32>, vector<10x8xf32>, vector<10x8xf32> -> vector<10x8xf32>
    %207 = vector.extract_strided_slice %188 {offsets = [0, 8], sizes = [10, 8], strides = [1, 1]} : vector<10x96xf32> to vector<10x8xf32>
    %208 = vector.extract_strided_slice %188 {offsets = [0, 40], sizes = [10, 8], strides = [1, 1]} : vector<10x96xf32> to vector<10x8xf32>
    %209 = vector.extract_strided_slice %188 {offsets = [0, 72], sizes = [10, 8], strides = [1, 1]} : vector<10x96xf32> to vector<10x8xf32>
    %cst_77 = arith.constant dense<0.000000e+00> : vector<10x10xf32>
    %210 = tpu.matmul %207, %208, %cst_77 {dimension_numbers = #tpu.dot_dimension_numbers<[1], [1], [0], [0], [0, 0, 1, 0], [], []>} : vector<10x8xf32>, vector<10x8xf32>, vector<10x10xf32> -> vector<10x10xf32>
    %cst_78 = arith.constant 0.353553385 : f32
    %211 = vector.broadcast %cst_78 : f32 to vector<10x10xf32>
    %212 = arith.mulf %210, %211 : vector<10x10xf32>
    %213 = arith.addf %212, %3 : vector<10x10xf32>
    %cst_79 = arith.constant dense<0xFF800000> : vector<10xf32>
    %214 = vector.multi_reduction <maximumf>, %213, %cst_79 [1] : vector<10x10xf32> to vector<10xf32>
    %215 = vector.shape_cast %214 : vector<10xf32> to vector<10x1xf32>
    %216 = vector.broadcast %215 : vector<10x1xf32> to vector<10x10xf32>
    %217 = arith.subf %213, %216 : vector<10x10xf32>
    %218 = math.exp %217 : vector<10x10xf32>
    %cst_80 = arith.constant dense<0.000000e+00> : vector<10xf32>
    %219 = vector.multi_reduction <add>, %218, %cst_80 [1] : vector<10x10xf32> to vector<10xf32>
    %220 = vector.shape_cast %219 : vector<10xf32> to vector<10x1xf32>
    %221 = tpu.reciprocal %220 {approx = true} : vector<10x1xf32> -> vector<10x1xf32>
    %222 = vector.broadcast %221 : vector<10x1xf32> to vector<10x10xf32>
    %223 = arith.mulf %218, %222 : vector<10x10xf32>
    %cst_81 = arith.constant dense<0.000000e+00> : vector<10x8xf32>
    %224 = tpu.matmul %223, %209, %cst_81 {dimension_numbers = #tpu.dot_dimension_numbers<[1], [0], [0], [1], [0, 0, 1, 1], [], []>} : vector<10x10xf32>, vector<10x8xf32>, vector<10x8xf32> -> vector<10x8xf32>
    %225 = vector.extract_strided_slice %188 {offsets = [0, 16], sizes = [10, 8], strides = [1, 1]} : vector<10x96xf32> to vector<10x8xf32>
    %226 = vector.extract_strided_slice %188 {offsets = [0, 48], sizes = [10, 8], strides = [1, 1]} : vector<10x96xf32> to vector<10x8xf32>
    %227 = vector.extract_strided_slice %188 {offsets = [0, 80], sizes = [10, 8], strides = [1, 1]} : vector<10x96xf32> to vector<10x8xf32>
    %cst_82 = arith.constant dense<0.000000e+00> : vector<10x10xf32>
    %228 = tpu.matmul %225, %226, %cst_82 {dimension_numbers = #tpu.dot_dimension_numbers<[1], [1], [0], [0], [0, 0, 1, 0], [], []>} : vector<10x8xf32>, vector<10x8xf32>, vector<10x10xf32> -> vector<10x10xf32>
    %cst_83 = arith.constant 0.353553385 : f32
    %229 = vector.broadcast %cst_83 : f32 to vector<10x10xf32>
    %230 = arith.mulf %228, %229 : vector<10x10xf32>
    %231 = arith.addf %230, %3 : vector<10x10xf32>
    %cst_84 = arith.constant dense<0xFF800000> : vector<10xf32>
    %232 = vector.multi_reduction <maximumf>, %231, %cst_84 [1] : vector<10x10xf32> to vector<10xf32>
    %233 = vector.shape_cast %232 : vector<10xf32> to vector<10x1xf32>
    %234 = vector.broadcast %233 : vector<10x1xf32> to vector<10x10xf32>
    %235 = arith.subf %231, %234 : vector<10x10xf32>
    %236 = math.exp %235 : vector<10x10xf32>
    %cst_85 = arith.constant dense<0.000000e+00> : vector<10xf32>
    %237 = vector.multi_reduction <add>, %236, %cst_85 [1] : vector<10x10xf32> to vector<10xf32>
    %238 = vector.shape_cast %237 : vector<10xf32> to vector<10x1xf32>
    %239 = tpu.reciprocal %238 {approx = true} : vector<10x1xf32> -> vector<10x1xf32>
    %240 = vector.broadcast %239 : vector<10x1xf32> to vector<10x10xf32>
    %241 = arith.mulf %236, %240 : vector<10x10xf32>
    %cst_86 = arith.constant dense<0.000000e+00> : vector<10x8xf32>
    %242 = tpu.matmul %241, %227, %cst_86 {dimension_numbers = #tpu.dot_dimension_numbers<[1], [0], [0], [1], [0, 0, 1, 1], [], []>} : vector<10x10xf32>, vector<10x8xf32>, vector<10x8xf32> -> vector<10x8xf32>
    %243 = vector.extract_strided_slice %188 {offsets = [0, 24], sizes = [10, 8], strides = [1, 1]} : vector<10x96xf32> to vector<10x8xf32>
    %244 = vector.extract_strided_slice %188 {offsets = [0, 56], sizes = [10, 8], strides = [1, 1]} : vector<10x96xf32> to vector<10x8xf32>
    %245 = vector.extract_strided_slice %188 {offsets = [0, 88], sizes = [10, 8], strides = [1, 1]} : vector<10x96xf32> to vector<10x8xf32>
    %cst_87 = arith.constant dense<0.000000e+00> : vector<10x10xf32>
    %246 = tpu.matmul %243, %244, %cst_87 {dimension_numbers = #tpu.dot_dimension_numbers<[1], [1], [0], [0], [0, 0, 1, 0], [], []>} : vector<10x8xf32>, vector<10x8xf32>, vector<10x10xf32> -> vector<10x10xf32>
    %cst_88 = arith.constant 0.353553385 : f32
    %247 = vector.broadcast %cst_88 : f32 to vector<10x10xf32>
    %248 = arith.mulf %246, %247 : vector<10x10xf32>
    %249 = arith.addf %248, %3 : vector<10x10xf32>
    %cst_89 = arith.constant dense<0xFF800000> : vector<10xf32>
    %250 = vector.multi_reduction <maximumf>, %249, %cst_89 [1] : vector<10x10xf32> to vector<10xf32>
    %251 = vector.shape_cast %250 : vector<10xf32> to vector<10x1xf32>
    %252 = vector.broadcast %251 : vector<10x1xf32> to vector<10x10xf32>
    %253 = arith.subf %249, %252 : vector<10x10xf32>
    %254 = math.exp %253 : vector<10x10xf32>
    %cst_90 = arith.constant dense<0.000000e+00> : vector<10xf32>
    %255 = vector.multi_reduction <add>, %254, %cst_90 [1] : vector<10x10xf32> to vector<10xf32>
    %256 = vector.shape_cast %255 : vector<10xf32> to vector<10x1xf32>
    %257 = tpu.reciprocal %256 {approx = true} : vector<10x1xf32> -> vector<10x1xf32>
    %258 = vector.broadcast %257 : vector<10x1xf32> to vector<10x10xf32>
    %259 = arith.mulf %254, %258 : vector<10x10xf32>
    %cst_91 = arith.constant dense<0.000000e+00> : vector<10x8xf32>
    %260 = tpu.matmul %259, %245, %cst_91 {dimension_numbers = #tpu.dot_dimension_numbers<[1], [0], [0], [1], [0, 0, 1, 1], [], []>} : vector<10x10xf32>, vector<10x8xf32>, vector<10x8xf32> -> vector<10x8xf32>
    %261 = tpu.concatenate %206, %224, %242, %260 in 1 : vector<10x8xf32>, vector<10x8xf32>, vector<10x8xf32>, vector<10x8xf32> -> vector<10x32xf32>
    %262 = vector.extract_strided_slice %161 {offsets = [0, 96], sizes = [32, 32], strides = [1, 1]} : vector<32x128xf32> to vector<32x32xf32>
    %cst_92 = arith.constant dense<0.000000e+00> : vector<10x32xf32>
    %263 = tpu.matmul %261, %262, %cst_92 {dimension_numbers = #tpu.dot_dimension_numbers<[1], [0], [0], [1], [0, 0, 1, 1], [], []>} : vector<10x32xf32>, vector<32x32xf32>, vector<10x32xf32> -> vector<10x32xf32>
    %264 = arith.addf %159, %263 : vector<10x32xf32>
    %c11 = arith.constant 11 : index
    %c0_93 = arith.constant 0 : index
    %265 = vector.load %arg8[%c11, %c0_93] : memref<32x256xf32, #tpu.memory_space<vmem>>, vector<1x32xf32>
    %266 = vector.broadcast %265 : vector<1x32xf32> to vector<10x32xf32>
    %267 = arith.addf %264, %266 : vector<10x32xf32>
    %c12 = arith.constant 12 : index
    %c0_94 = arith.constant 0 : index
    %268 = vector.load %arg8[%c12, %c0_94] : memref<32x256xf32, #tpu.memory_space<vmem>>, vector<1x32xf32>
    %c13 = arith.constant 13 : index
    %c0_95 = arith.constant 0 : index
    %269 = vector.load %arg8[%c13, %c0_95] : memref<32x256xf32, #tpu.memory_space<vmem>>, vector<1x32xf32>
    %cst_96 = arith.constant dense<0.000000e+00> : vector<10xf32>
    %270 = vector.multi_reduction <add>, %267, %cst_96 [1] : vector<10x32xf32> to vector<10xf32>
    %271 = vector.shape_cast %270 : vector<10xf32> to vector<10x1xf32>
    %cst_97 = arith.constant 3.200000e+01 : f32
    %272 = vector.broadcast %cst_97 : f32 to vector<10x1xf32>
    %273 = arith.divf %271, %272 : vector<10x1xf32>
    %274 = vector.broadcast %273 : vector<10x1xf32> to vector<10x32xf32>
    %275 = arith.subf %267, %274 : vector<10x32xf32>
    %276 = arith.mulf %275, %275 : vector<10x32xf32>
    %cst_98 = arith.constant dense<0.000000e+00> : vector<10xf32>
    %277 = vector.multi_reduction <add>, %276, %cst_98 [1] : vector<10x32xf32> to vector<10xf32>
    %278 = vector.shape_cast %277 : vector<10xf32> to vector<10x1xf32>
    %cst_99 = arith.constant 3.200000e+01 : f32
    %279 = vector.broadcast %cst_99 : f32 to vector<10x1xf32>
    %280 = arith.divf %278, %279 : vector<10x1xf32>
    %cst_100 = arith.constant 9.99999996E-13 : f32
    %281 = vector.broadcast %cst_100 : f32 to vector<10x1xf32>
    %282 = arith.addf %280, %281 : vector<10x1xf32>
    %283 = math.rsqrt %282 : vector<10x1xf32>
    %284 = vector.broadcast %283 : vector<10x1xf32> to vector<10x32xf32>
    %285 = arith.mulf %275, %284 : vector<10x32xf32>
    %286 = vector.broadcast %268 : vector<1x32xf32> to vector<10x32xf32>
    %287 = arith.mulf %285, %286 : vector<10x32xf32>
    %288 = vector.broadcast %269 : vector<1x32xf32> to vector<10x32xf32>
    %289 = arith.addf %287, %288 : vector<10x32xf32>
    %c1_101 = arith.constant 1 : index
    %c0_102 = arith.constant 0 : index
    %c0_103 = arith.constant 0 : index
    %290 = vector.load %arg4[%c1_101, %c0_102, %c0_103] : memref<2x32x128xf32, #tpu.memory_space<vmem>>, vector<1x32x128xf32>
    %291 = vector.shape_cast %290 : vector<1x32x128xf32> to vector<32x128xf32>
    %cst_104 = arith.constant dense<0.000000e+00> : vector<10x128xf32>
    %292 = tpu.matmul %289, %291, %cst_104 {dimension_numbers = #tpu.dot_dimension_numbers<[1], [0], [0], [1], [0, 0, 1, 1], [], []>} : vector<10x32xf32>, vector<32x128xf32>, vector<10x128xf32> -> vector<10x128xf32>
    %c14 = arith.constant 14 : index
    %c0_105 = arith.constant 0 : index
    %293 = vector.load %arg8[%c14, %c0_105] : memref<32x256xf32, #tpu.memory_space<vmem>>, vector<1x128xf32>
    %294 = vector.broadcast %293 : vector<1x128xf32> to vector<10x128xf32>
    %295 = arith.addf %292, %294 : vector<10x128xf32>
    %296 = arith.mulf %295, %295 : vector<10x128xf32>
    %297 = arith.mulf %295, %296 : vector<10x128xf32>
    %cst_106 = arith.constant 4.471500e-02 : f32
    %298 = vector.broadcast %cst_106 : f32 to vector<10x128xf32>
    %299 = arith.mulf %298, %297 : vector<10x128xf32>
    %300 = arith.addf %295, %299 : vector<10x128xf32>
    %cst_107 = arith.constant 0.797884583 : f32
    %301 = vector.broadcast %cst_107 : f32 to vector<10x128xf32>
    %302 = arith.mulf %301, %300 : vector<10x128xf32>
    %303 = math.tanh %302 : vector<10x128xf32>
    %cst_108 = arith.constant 1.000000e+00 : f32
    %304 = vector.broadcast %cst_108 : f32 to vector<10x128xf32>
    %305 = arith.addf %304, %303 : vector<10x128xf32>
    %cst_109 = arith.constant 5.000000e-01 : f32
    %306 = vector.broadcast %cst_109 : f32 to vector<10x128xf32>
    %307 = arith.mulf %306, %305 : vector<10x128xf32>
    %308 = arith.mulf %295, %307 : vector<10x128xf32>
    %c1_110 = arith.constant 1 : index
    %c0_111 = arith.constant 0 : index
    %c0_112 = arith.constant 0 : index
    %309 = vector.load %arg5[%c1_110, %c0_111, %c0_112] : memref<2x128x32xf32, #tpu.memory_space<vmem>>, vector<1x128x32xf32>
    %310 = vector.shape_cast %309 : vector<1x128x32xf32> to vector<128x32xf32>
    %cst_113 = arith.constant dense<0.000000e+00> : vector<10x32xf32>
    %311 = tpu.matmul %308, %310, %cst_113 {dimension_numbers = #tpu.dot_dimension_numbers<[1], [0], [0], [1], [0, 0, 1, 1], [], []>} : vector<10x128xf32>, vector<128x32xf32>, vector<10x32xf32> -> vector<10x32xf32>
    %312 = arith.addf %267, %311 : vector<10x32xf32>
    %c15 = arith.constant 15 : index
    %c0_114 = arith.constant 0 : index
    %313 = vector.load %arg8[%c15, %c0_114] : memref<32x256xf32, #tpu.memory_space<vmem>>, vector<1x32xf32>
    %314 = vector.broadcast %313 : vector<1x32xf32> to vector<10x32xf32>
    %315 = arith.addf %312, %314 : vector<10x32xf32>
    %316 = vector.extract_strided_slice %315 {offsets = [0, 0], sizes = [1, 32], strides = [1, 1]} : vector<10x32xf32> to vector<1x32xf32>
    %317 = vector.extract_strided_slice %315 {offsets = [5, 0], sizes = [1, 32], strides = [1, 1]} : vector<10x32xf32> to vector<1x32xf32>
    %318 = tpu.concatenate %316, %317 in 0 : vector<1x32xf32>, vector<1x32xf32> -> vector<2x32xf32>
    %c16 = arith.constant 16 : index
    %c0_115 = arith.constant 0 : index
    %319 = vector.load %arg8[%c16, %c0_115] : memref<32x256xf32, #tpu.memory_space<vmem>>, vector<1x32xf32>
    %c17 = arith.constant 17 : index
    %c0_116 = arith.constant 0 : index
    %320 = vector.load %arg8[%c17, %c0_116] : memref<32x256xf32, #tpu.memory_space<vmem>>, vector<1x32xf32>
    %cst_117 = arith.constant dense<0.000000e+00> : vector<2xf32>
    %321 = vector.multi_reduction <add>, %318, %cst_117 [1] : vector<2x32xf32> to vector<2xf32>
    %322 = vector.shape_cast %321 : vector<2xf32> to vector<2x1xf32>
    %cst_118 = arith.constant 3.200000e+01 : f32
    %323 = vector.broadcast %cst_118 : f32 to vector<2x1xf32>
    %324 = arith.divf %322, %323 : vector<2x1xf32>
    %325 = vector.broadcast %324 : vector<2x1xf32> to vector<2x32xf32>
    %326 = arith.subf %318, %325 : vector<2x32xf32>
    %327 = arith.mulf %326, %326 : vector<2x32xf32>
    %cst_119 = arith.constant dense<0.000000e+00> : vector<2xf32>
    %328 = vector.multi_reduction <add>, %327, %cst_119 [1] : vector<2x32xf32> to vector<2xf32>
    %329 = vector.shape_cast %328 : vector<2xf32> to vector<2x1xf32>
    %cst_120 = arith.constant 3.200000e+01 : f32
    %330 = vector.broadcast %cst_120 : f32 to vector<2x1xf32>
    %331 = arith.divf %329, %330 : vector<2x1xf32>
    %cst_121 = arith.constant 9.99999996E-13 : f32
    %332 = vector.broadcast %cst_121 : f32 to vector<2x1xf32>
    %333 = arith.addf %331, %332 : vector<2x1xf32>
    %334 = math.rsqrt %333 : vector<2x1xf32>
    %335 = vector.broadcast %334 : vector<2x1xf32> to vector<2x32xf32>
    %336 = arith.mulf %326, %335 : vector<2x32xf32>
    %337 = vector.broadcast %319 : vector<1x32xf32> to vector<2x32xf32>
    %338 = arith.mulf %336, %337 : vector<2x32xf32>
    %339 = vector.broadcast %320 : vector<1x32xf32> to vector<2x32xf32>
    %340 = arith.addf %338, %339 : vector<2x32xf32>
    %c18 = arith.constant 18 : index
    %c0_122 = arith.constant 0 : index
    %341 = vector.load %arg8[%c18, %c0_122] : memref<32x256xf32, #tpu.memory_space<vmem>>, vector<1x32xf32>
    %c19 = arith.constant 19 : index
    %c0_123 = arith.constant 0 : index
    %342 = vector.load %arg8[%c19, %c0_123] : memref<32x256xf32, #tpu.memory_space<vmem>>, vector<1x32xf32>
    %cst_124 = arith.constant dense<0.000000e+00> : vector<2xf32>
    %343 = vector.multi_reduction <add>, %340, %cst_124 [1] : vector<2x32xf32> to vector<2xf32>
    %344 = vector.shape_cast %343 : vector<2xf32> to vector<2x1xf32>
    %cst_125 = arith.constant 3.200000e+01 : f32
    %345 = vector.broadcast %cst_125 : f32 to vector<2x1xf32>
    %346 = arith.divf %344, %345 : vector<2x1xf32>
    %347 = vector.broadcast %346 : vector<2x1xf32> to vector<2x32xf32>
    %348 = arith.subf %340, %347 : vector<2x32xf32>
    %349 = arith.mulf %348, %348 : vector<2x32xf32>
    %cst_126 = arith.constant dense<0.000000e+00> : vector<2xf32>
    %350 = vector.multi_reduction <add>, %349, %cst_126 [1] : vector<2x32xf32> to vector<2xf32>
    %351 = vector.shape_cast %350 : vector<2xf32> to vector<2x1xf32>
    %cst_127 = arith.constant 3.200000e+01 : f32
    %352 = vector.broadcast %cst_127 : f32 to vector<2x1xf32>
    %353 = arith.divf %351, %352 : vector<2x1xf32>
    %cst_128 = arith.constant 9.99999974E-6 : f32
    %354 = vector.broadcast %cst_128 : f32 to vector<2x1xf32>
    %355 = arith.addf %353, %354 : vector<2x1xf32>
    %356 = math.rsqrt %355 : vector<2x1xf32>
    %357 = vector.broadcast %356 : vector<2x1xf32> to vector<2x32xf32>
    %358 = arith.mulf %348, %357 : vector<2x32xf32>
    %359 = vector.broadcast %341 : vector<1x32xf32> to vector<2x32xf32>
    %360 = arith.mulf %358, %359 : vector<2x32xf32>
    %361 = vector.broadcast %342 : vector<1x32xf32> to vector<2x32xf32>
    %362 = arith.addf %360, %361 : vector<2x32xf32>
    %c0_129 = arith.constant 0 : index
    %c0_130 = arith.constant 0 : index
    %363 = vector.load %arg6[%c0_129, %c0_130] : memref<32x256xf32, #tpu.memory_space<vmem>>, vector<32x256xf32>
    %cst_131 = arith.constant dense<0.000000e+00> : vector<2x256xf32>
    %364 = tpu.matmul %362, %363, %cst_131 {dimension_numbers = #tpu.dot_dimension_numbers<[1], [0], [0], [1], [0, 0, 1, 1], [], []>} : vector<2x32xf32>, vector<32x256xf32>, vector<2x256xf32> -> vector<2x256xf32>
    %c20 = arith.constant 20 : index
    %c0_132 = arith.constant 0 : index
    %365 = vector.load %arg8[%c20, %c0_132] : memref<32x256xf32, #tpu.memory_space<vmem>>, vector<1x256xf32>
    %366 = vector.broadcast %365 : vector<1x256xf32> to vector<2x256xf32>
    %367 = arith.addf %364, %366 : vector<2x256xf32>
    %368 = vector.extract_strided_slice %367 {offsets = [0, 0], sizes = [2, 128], strides = [1, 1]} : vector<2x256xf32> to vector<2x128xf32>
    %369 = vector.extract_strided_slice %367 {offsets = [0, 128], sizes = [2, 128], strides = [1, 1]} : vector<2x256xf32> to vector<2x128xf32>
    %370 = arith.negf %368 : vector<2x128xf32>
    %371 = math.exp %370 : vector<2x128xf32>
    %cst_133 = arith.constant 1.000000e+00 : f32
    %372 = vector.broadcast %cst_133 : f32 to vector<2x128xf32>
    %373 = arith.addf %372, %371 : vector<2x128xf32>
    %374 = arith.divf %372, %373 : vector<2x128xf32>
    %375 = arith.mulf %368, %374 : vector<2x128xf32>
    %376 = arith.mulf %375, %369 : vector<2x128xf32>
    %c0_134 = arith.constant 0 : index
    %c0_135 = arith.constant 0 : index
    %377 = vector.load %arg7[%c0_134, %c0_135] : memref<128x192xf32, #tpu.memory_space<vmem>>, vector<128x192xf32>
    %cst_136 = arith.constant dense<0.000000e+00> : vector<2x192xf32>
    %378 = tpu.matmul %376, %377, %cst_136 {dimension_numbers = #tpu.dot_dimension_numbers<[1], [0], [0], [1], [0, 0, 1, 1], [], []>} : vector<2x128xf32>, vector<128x192xf32>, vector<2x192xf32> -> vector<2x192xf32>
    %c21 = arith.constant 21 : index
    %c0_137 = arith.constant 0 : index
    %379 = vector.load %arg8[%c21, %c0_137] : memref<32x256xf32, #tpu.memory_space<vmem>>, vector<1x192xf32>
    %380 = vector.broadcast %379 : vector<1x192xf32> to vector<2x192xf32>
    %381 = arith.addf %378, %380 : vector<2x192xf32>
    %382 = tpu.concatenate %340, %362, %381 in 1 : vector<2x32xf32>, vector<2x32xf32>, vector<2x192xf32> -> vector<2x256xf32>
    %c0_138 = arith.constant 0 : index
    %c0_139 = arith.constant 0 : index
    %383 = vector.load %arg9[%c0_138, %c0_139] : memref<2x256xf32, #tpu.memory_space<vmem>>, vector<2x256xf32>
    tpu.vector_store %arg9[%c0_138, %c0_139], %382 {strides = array<i32>} : memref<2x256xf32, #tpu.memory_space<vmem>>, vector<2x256xf32>,
    return
  }
  func.func @transform_0(%arg0: i32) -> (i32, i32) {
    %c0_i32 = arith.constant 0 : i32
    %c0_i32_0 = arith.constant 0 : i32
    %c0_i32_1 = arith.constant 0 : i32
    return %c0_i32, %c0_i32_0 : i32, i32
  }
  func.func @transform_1(%arg0: i32) -> (i32, i32) {
    %c0_i32 = arith.constant 0 : i32
    %c0_i32_0 = arith.constant 0 : i32
    %c0_i32_1 = arith.constant 0 : i32
    return %c0_i32, %c0_i32_0 : i32, i32
  }
  func.func @transform_2(%arg0: i32) -> (i32, i32, i32) {
    %c0_i32 = arith.constant 0 : i32
    %c0_i32_0 = arith.constant 0 : i32
    %c0_i32_1 = arith.constant 0 : i32
    %c0_i32_2 = arith.constant 0 : i32
    return %c0_i32, %c0_i32_0, %c0_i32_1 : i32, i32, i32
  }
  func.func @transform_3(%arg0: i32) -> (i32, i32, i32) {
    %c0_i32 = arith.constant 0 : i32
    %c0_i32_0 = arith.constant 0 : i32
    %c0_i32_1 = arith.constant 0 : i32
    %c0_i32_2 = arith.constant 0 : i32
    return %c0_i32, %c0_i32_0, %c0_i32_1 : i32, i32, i32
  }
  func.func @transform_4(%arg0: i32) -> (i32, i32, i32) {
    %c0_i32 = arith.constant 0 : i32
    %c0_i32_0 = arith.constant 0 : i32
    %c0_i32_1 = arith.constant 0 : i32
    %c0_i32_2 = arith.constant 0 : i32
    return %c0_i32, %c0_i32_0, %c0_i32_1 : i32, i32, i32
  }
  func.func @transform_5(%arg0: i32) -> (i32, i32) {
    %c0_i32 = arith.constant 0 : i32
    %c0_i32_0 = arith.constant 0 : i32
    %c0_i32_1 = arith.constant 0 : i32
    return %c0_i32, %c0_i32_0 : i32, i32
  }
  func.func @transform_6(%arg0: i32) -> (i32, i32) {
    %c0_i32 = arith.constant 0 : i32
    %c0_i32_0 = arith.constant 0 : i32
    %c0_i32_1 = arith.constant 0 : i32
    return %c0_i32, %c0_i32_0 : i32, i32
  }
  func.func @transform_7(%arg0: i32) -> (i32, i32) {
    %c0_i32 = arith.constant 0 : i32
    %c0_i32_0 = arith.constant 0 : i32
    %c0_i32_1 = arith.constant 0 : i32
    return %c0_i32, %c0_i32_0 : i32, i32
  }
  func.func @transform_8(%arg0: i32) -> (i32, i32) {
    %c0_i32 = arith.constant 0 : i32
    %c0_i32_0 = arith.constant 0 : i32
    %c0_i32_1 = arith.constant 0 : i32
    return %c0_i32, %c0_i32_0 : i32, i32
  }
}

</mosaic_0001>

<bundles_post_ra>
// kernel: vit_classifier_forward.1
= control target key start
LH: loop header
LB: loop body
LE: loop exit
PB: predicated region body
PF: predicated region fallthrough
CT: control target
= control target key end

     0   :  { %vm148_vm0 = vcmask 261120   ;;  %vm152_vm1 = vcmask 254976   ;;  %vm269_vm2 = vcmask 64512   ;;  %s4057_s23 = smov 96   ;;  %s4058_s24 = smov 88   ;;  %vm357_vm4 = vcmask 1041408   ;;  %s4955_s1 = inlined_call_operand.vmem [shape: f32[256,32], index: 1, kind: input, shape index: {}]   ;;  %s4956_s0 = inlined_call_operand.vmem [shape: f32[10,256], index: 0, kind: input, shape index: {}]   ;;  %s4957_s2 = inlined_call_operand.vmem [shape: f32[2,32,128], index: 2, kind: input, shape index: {}]   ;;  %s4958_s7 = inlined_call_operand.vmem [shape: f32[32,256], index: 7, kind: input, shape index: {}]   ;;  %s4959_s3 = inlined_call_operand.vmem [shape: f32[2,32,128], index: 3, kind: input, shape index: {}]   ;;  %s4960_s4 = inlined_call_operand.vmem [shape: f32[2,128,32], index: 4, kind: input, shape index: {}]   ;;  %s4961_s5 = inlined_call_operand.vmem [shape: f32[32,256], index: 5, kind: input, shape index: {}]   ;;  %s4962_s6 = inlined_call_operand.vmem [shape: f32[128,192], index: 6, kind: input, shape index: {}]   ;;  %s4963_s8 = inlined_call_operand.vmem [shape: f32[2,256], index: 8, kind: output, shape index: {}]  }
   0x1   :  { %v49_v0 = vld [vmem:[%s4955_s1 + $0x80] sm:$0xff]  ;;  %v50_v1 = vld [vmem:[%s4955_s1 + $0x88] sm:$0xff]  ;;  %v51_v5 = vld [vmem:[%s4955_s1 + $0x90] sm:$0xff]  ;;  %s4059_s25 = smov 120   ;;  %vm365_vm5 = vcmask 80896   ;;  %vm369_vm6 = vcmask 74752  }
   0x2   :  { %v33_v2 = vld [vmem:[%s4955_s1] sm:$0xff]  ;;  %v3564_v3 = vpack.c.bf16 %v50_v1, %v49_v0  ;;  %v34_v4 = vld [vmem:[%s4955_s1 + $0x8] sm:$0xff]  ;;  %v52_v6 = vld [vmem:[%s4955_s1 + $0x98] sm:$0xff]  ;;  %s4060_s30 = smov 64   ;;  %vm4061_vm7 = vmmov 1   ;;  %s4062_s9 = smov 56  }
   0x3   :  { %v3566_v7 = vpack.c.bf16 %v34_v4, %v33_v2  ;;  %v3568_v8 = vpack.c.bf16 %v52_v6, %v51_v5  ;;  %v35_v9 = vld [vmem:[%s4955_s1 + $0x10] sm:$0xff]  ;;  %v36_v10 = vld [vmem:[%s4955_s1 + $0x18] sm:$0xff]  ;;  %v53_v11 = vld [vmem:[%s4955_s1 + $0xa0] sm:$0xff]  ;;  %s4063_s10 = smov 72   ;;  %s4066_s11 = smov 80   ;;  %vm1118_vm9 = vcmask 130048  }
   0x4   :  { %3565 = vmatprep.subr.bf16.mxu0 %v3564_v3  ;;  %v54_v12 = vld [vmem:[%s4955_s1 + $0xa8] sm:$0xff]  ;;  %v3570_v13 = vpack.c.bf16 %v36_v10, %v35_v9  ;;  %v37_v15 = vld [vmem:[%s4955_s1 + $0x20] sm:$0xff]  ;;  %v55_v17 = vld [vmem:[%s4955_s1 + $0xb0] sm:$0xff]  ;;  %s4067_s12 = smov 40   ;;  %s4068_s13 = smov 48   ;;  %vm1121_vm10 = vcmask 195584  }
   0x5   :  { %3567 = vmatpush3.bf16.msra.mxu0 %v3566_v7  ;;  %v3572_v14 = vpack.c.bf16 %v54_v12, %v53_v11  ;;  %v38_v16 = vld [vmem:[%s4955_s1 + $0x28] sm:$0xff]  ;;  %v56_v18 = vld [vmem:[%s4955_s1 + $0xb8] sm:$0xff]  ;;  %v39_v21 = vld [vmem:[%s4955_s1 + $0x30] sm:$0xff]  ;;  %s4069_s14 = smov 32   ;;  %s4070_s15 = smov 8   ;;  %vm2761_vm11 = vcmask 1040384  }
   0x6   :  { %3569 = vmatprep.subr.bf16.mxu0 %v3568_v8  ;;  %v3574_v19 = vpack.c.bf16 %v38_v16, %v37_v15  ;;  %v3576_v20 = vpack.c.bf16 %v56_v18, %v55_v17  ;;  %v40_v22 = vld [vmem:[%s4955_s1 + $0x38] sm:$0xff]  ;;  %v57_v23 = vld [vmem:[%s4955_s1 + $0xc0] sm:$0xff]  ;;  %v58_v24 = vld [vmem:[%s4955_s1 + $0xc8] sm:$0xff]  ;;  %s4071_s16 = smov 16   ;;  %s4964_s17 = smov 24   ;;  %vm3025_vm12 = vcmask 523264  }
   0x7   :  { %v30_v25 = vld [vmem:[%s4956_s0 + $0x8] sm:$0xff]  ;;  %v3578_v26 = vpack.c.bf16 %v40_v22, %v39_v21  ;;  %v3580_v27 = vpack.c.bf16 %v58_v24, %v57_v23  ;;  %v41_v28 = vld [vmem:[%s4955_s1 + $0x40] sm:$0xff]  ;;  %v59_v30 = vld [vmem:[%s4955_s1 + $0xd0] sm:$0xff] }
   0x8   :  { %129 = vmatprep.mubr.f32.mxu0 %v30_v25  ;;  %v42_v29 = vld [vmem:[%s4955_s1 + $0x48] sm:$0xff]  ;;  %v60_v31 = vld [vmem:[%s4955_s1 + $0xd8] sm:$0xff]  ;;  %v43_v34 = vld [vmem:[%s4955_s1 + $0x50] sm:$0xff] }
   0x9   :  { %3571 = vmatpush3.bf16.msra.mxu0 %v3570_v13  ;;  %v3582_v32 = vpack.c.bf16 %v42_v29, %v41_v28  ;;  %v3584_v33 = vpack.c.bf16 %v60_v31, %v59_v30  ;;  %v44_v35 = vld [vmem:[%s4955_s1 + $0x58] sm:$0xff]  ;;  %v61_v36 = vld [vmem:[%s4955_s1 + $0xe0] sm:$0xff]  ;;  %v62_v37 = vld [vmem:[%s4955_s1 + $0xe8] sm:$0xff] }
   0xa   :  { %3573 = vmatprep.subr.bf16.mxu0 %v3572_v14  ;;  %v3586_v38 = vpack.c.bf16 %v44_v35, %v43_v34  ;;  %v3588_v39 = vpack.c.bf16 %v62_v37, %v61_v36  ;;  %v45_v40 = vld [vmem:[%s4955_s1 + $0x60] sm:$0xff]  ;;  %v46_v41 = vld [vmem:[%s4955_s1 + $0x68] sm:$0xff]  ;;  %v63_v42 = vld [vmem:[%s4955_s1 + $0xf0] sm:$0xff] }
   0xb   :  { %v64_v43 = vld [vmem:[%s4955_s1 + $0xf8] sm:$0xff]  ;;  %v3590_v44 = vpack.c.bf16 %v46_v41, %v45_v40  ;;  %v47_v46 = vld [vmem:[%s4955_s1 + $0x70] sm:$0xff]  ;;  %v29_v49 = vld [vmem:[%s4956_s0] sm:$0xff] }
   0xc   :  { %v3592_v45 = vpack.c.bf16 %v64_v43, %v63_v42  ;;  %v48_v47 = vld [vmem:[%s4955_s1 + $0x78] sm:$0xff]  ;;  %v31_v51 = vld [vmem:[%s4956_s0 + $0x10] sm:$0x3]  ;;  %v4242_v6 = vld [vmem:[%s4957_s2] sm:$0xff]  ;;  %s4065_s1 = smov 104  }
   0xd   :  { %3575 = vmatpush3.bf16.msra.mxu0 %v3574_v19  ;;  %v3594_v48 = vpack.c.bf16 %v48_v47, %v47_v46  ;;  %v32_v50 = vld [vmem:[%s4956_s0 + $0x18] sm:$0x3]  ;;  %v4247_v7 = vld [vmem:[%s4957_s2 + $0x8] sm:$0xff]  ;;  %v4252_v8 = vld [vmem:[%s4957_s2 + $0x10] sm:$0xff]  ;;  %s4064_s0 = smov 112  }
   0xe   :  { %3577 = vmatprep.subr.bf16.mxu0 %v3576_v20  ;;  %v3901_v9 = vpack.i.bf16 %v4247_v7, %v4242_v6  ;;  %v3596_v10 = vpack.c.bf16 %v4247_v7, %v4242_v6  ;;  %v4261_v11 = vld [vmem:[%s4957_s2 + $0x18] sm:$0xff]  ;;  %v146_v20 = vld [vmem:[%s4958_s7] ss:$0 sm:$0xff]  ;;  %v147_v22 = vld [vmem:[%s4958_s7 + $0x1] ss:$0 sm:$0xff] }
   0xf   :  { %v3600_v12 = vpack.c.bf16 %v4261_v11, %v4252_v8  ;;  %v181_v29 = vld [vmem:[%s4958_s7 + $0x2] ss:$0 sm:$0xff]  ;;  %vm4296_vm3 = vmpackc.low %vm269_vm2, %vm269_vm2  ;;  %v140_v40 = vld [vmem:[%s4958_s7 + $0x20] sm:$0xc0] }
  0x10   :  { %3597 = vmatprep.subr.bf16.mxu1 %v3596_v10  ;;  %v141_v41 = vld [vmem:[%s4958_s7 + $0x30] sm:$0xff]  ;;  %v358_v42 = vrot.slane %v140_v40, 6  ;;  %vm4327_vm8 = vmpackc.low %vm357_vm4, %vm4061_vm7 }
  0x11   :  { %3579 = vmatpush3.bf16.msra.mxu0 %v3578_v26  ;;  %3599 = vmatpush3.bf16.msra.mxu1 %v3596_v10  ;;  %v4312_v43 = vrot.slane %v141_v41, 6 }
  0x12   :  { %3581 = vmatprep.subr.bf16.mxu0 %v3580_v27  ;;  %3601 = vmatprep.subr.bf16.mxu1 %v3600_v12 }
  0x13   :  { %v4316_v46 = vsel %vm357_vm4, %v358_v42, %v4312_v43 }
  0x15   :  { %3583 = vmatpush3.bf16.msra.mxu0 %v3582_v32  ;;  %3603 = vmatpush3.bf16.msra.mxu1 %v3600_v12 }
  0x16   :  { %3585 = vmatprep.subr.bf16.mxu0 %v3584_v33 }
  0x19   :  { %3587 = vmatpush3.bf16.msra.mxu0 %v3586_v38 }
  0x1a   :  { %3589 = vmatprep.subr.bf16.mxu0 %v3588_v39 }
  0x1d   :  { %3591 = vmatpush3.bf16.msra.mxu0 %v3590_v44 }
  0x1e   :  { %3593 = vmatprep.subr.bf16.mxu0 %v3592_v45 }
  0x21   :  { %3595 = vmatpush3.bf16.msra.mxu0 %v3594_v48 }
  0x24   :  { %130 = vmatmul.mubr.f32.vlgmr.msra.gmra.mrb[0].mxu0 %v29_v49 }
  0x25   :  { %134 = vmatprep.mubr.f32.mxu0 %v32_v50 }
  0x28   :  { %135 = vmatmul.mubr.f32.gmra.mrb[2].mxu0 %v31_v51 }
  0xf7   :  { %v3174_v52 = vpop.f32.mrb[0].mxu0 }
  0xf8   :  { %v3175_v53 = vpop.f32.mrb[1].mxu0 }
  0xf9   :  { %v4227_v54 = vadd.f32 %v3175_v53, %v3174_v52 }
  0xfb   :  { %v3177_v55 = vpop.f32.mrb[2].mxu0  ;;  %v149_v56 = vsel %vm148_vm0, %v4227_v54, 0.0 }
  0xfc   :  { %v3178_v57 = vpop.f32.mrb[3].mxu0  ;;  %150 = vadd.xlane.f32.xlu0 %v149_v56 }
  0xfd   :  { %v4231_v58 = vadd.f32 %v3178_v57, %v3177_v55 }
  0xff   :  { %v153_v59 = vsel %vm152_vm1, %v4231_v58, 0.0 }
 0x100   :  { %154 = vadd.xlane.f32.xlu0 %v153_v59 }
 0x189   :  { %v151_v60 = vpop.xlane.xlu0 %150 }
 0x18a   :  { %v157_v61 = vmul.f32 0.03125, %v151_v60 }
 0x18c   :  { %v159_v62 = vsub.f32 %v4227_v54, %v157_v61 }
 0x18d   :  { %v155_v63 = vpop.xlane.xlu0 %154 }
 0x18e   :  { %v158_v0 = vmul.f32 0.03125, %v155_v63  ;;  %v161_v1 = vmul.f32 %v159_v62, %v159_v62 }
 0x190   :  { %v160_v2 = vsub.f32 %v4231_v58, %v158_v0  ;;  %v163_v3 = vsel %vm148_vm0, %v161_v1, 0.0 }
 0x191   :  { %164 = vadd.xlane.f32.xlu1 %v163_v3 }
 0x192   :  { %v162_v4 = vmul.f32 %v160_v2, %v160_v2 }
 0x194   :  { %v166_v5 = vsel %vm152_vm1, %v162_v4, 0.0 }
 0x195   :  { %167 = vadd.xlane.f32.xlu1 %v166_v5 }
 0x21e   :  { %v165_v13 = vpop.xlane.xlu1 %164 }
 0x21f   :  { %v169_v14 = vmul.f32 0.03125, %v165_v13 }
 0x221   :  { %v171_v15 = vadd.f32 1e-12, %v169_v14 }
 0x222   :  { %v168_v16 = vpop.xlane.xlu1 %167 }
 0x223   :  { %3961 = vrsqrt.f32 %v171_v15  ;;  %v170_v17 = vmul.f32 0.03125, %v168_v16 }
 0x225   :  { %v172_v18 = vadd.f32 1e-12, %v170_v17 }
 0x227   :  { %3963 = vrsqrt.f32 %v172_v18 }
 0x22d   :  { %v3962_v19 = vpop.eup %3961 }
 0x22e   :  { %v175_v21 = vmul.f32 %v3962_v19, %v159_v62 }
 0x230   :  { %v177_v23 = vmul.f32 %v175_v21, %v146_v20 }
 0x231   :  { %v3964_v24 = vpop.eup %3963 }
 0x232   :  { %v176_v25 = vmul.f32 %v3964_v24, %v160_v2  ;;  %v179_v26 = vadd.f32 %v177_v23, %v147_v22 }
 0x234   :  { %v178_v27 = vmul.f32 %v176_v25, %v146_v20  ;;  %3324 = vmatprep.mubr.msk.f32.mxu1 %vm148_vm0, %v179_v26 }
 0x236   :  { %v180_v28 = vadd.f32 %v178_v27, %v147_v22 }
 0x238   :  { %3325 = vmatmul.mubr.msk.f32.vlgmr.msra.gmra.mrb[0].mxu1 %vm148_vm0, %v180_v28 }
 0x30b   :  { %v3326_v30 = vpop.f32.mrb[0].mxu1 }
 0x30c   :  { %v4276_v31 = vadd.f32 %v3326_v30, %v181_v29  ;;  %v254_v32 = vpop.f32.mrb[1].mxu1 }
 0x30d   :  { %v4278_v33 = vadd.f32 %v254_v32, %v181_v29 }
 0x30f   :  { %3331 = vmatprep.mubr.msk.f32.mxu1 %vm269_vm2, %v4278_v33  ;;  %v4284_v34 = vpack.i.bf16 %v4276_v31, %v4278_v33 }
 0x311   :  { %3862 = vrot.lane.b32.xlu0 %v4284_v34, %s4057_s23 }
 0x315   :  { %3872 = vrot.lane.b32.xlu0 %v4284_v34, %s4058_s24 }
 0x319   :  { %477 = vrot.lane.b32.xlu0 %v4278_v33, %s4059_s25 }
 0x31d   :  { %479 = vrot.lane.b32.xlu0 %v4276_v31, %s4059_s25 }
 0x383   :  { %v3863_v35 = vpop.permute.xlu0 %3862 }
 0x384   :  { %v3865_v36 = vunpack.i.h.bf16 %v3863_v35  ;;  %v3864_v37 = vunpack.i.l.bf16 %v3863_v35 }
 0x386   :  { %v3604_v39 = vpack.c.bf16 %v3865_v36, %v3864_v37 }
 0x387   :  { %v3873_v3 = vpop.permute.xlu0 %3872 }
 0x388   :  { %3606 = vmatprep.subr.msk.bf16.mxu1 %vm4296_vm3, %v3604_v39  ;;  %v3875_v5 = vunpack.i.h.bf16 %v3873_v3  ;;  %v3874_v10 = vunpack.i.l.bf16 %v3873_v3 }
 0x389   :  { %3609 = vmatpush3.bf16.xpose.msk.msra.mxu1 %vm4296_vm3, %v3604_v39 }
 0x38a   :  { %v3616_v16 = vpack.c.bf16 %v3875_v5, %v3874_v10 }
 0x38b   :  { %v478_v21 = vpop.permute.xlu0 %477 }
 0x38f   :  { %v480_v22 = vpop.permute.xlu0 %479 }
 0x390   :  { %3332 = vmatmul.mubr.msk.f32.vlgmr.msra.gmra.mrb[2].mxu1 %vm269_vm2, %v4276_v31 }
 0x463   :  { %v3333_v44 = vpop.f32.mrb[2].mxu1 }
 0x464   :  { %v344_v45 = vpop.f32.mrb[3].mxu1  ;;  %v354_v47 = vmul.f32 0.35355338, %v3333_v44 }
 0x465   :  { %v353_v48 = vmul.f32 0.35355338, %v344_v45 }
 0x466   :  { %v364_v51 = vadd.f32 %v4312_v43, %v354_v47 }
 0x467   :  { %v363_v49 = vadd.f32 %v4316_v46, %v353_v48 }
 0x468   :  { %v370_v52 = vsel %vm369_vm6, %v364_v51, -inf }
 0x469   :  { %v366_v50 = vsel %vm365_vm5, %v363_v49, -inf }
 0x46a   :  { %367 = vmax.xlane.f32.xlu1 %v366_v50 }
 0x46e   :  { %371 = vmax.xlane.f32.xlu1 %v370_v52 }
 0x4f7   :  { %v368_v53 = vpop.xlane.xlu1 %367 }
 0x4f8   :  { %v373_v55 = vsub.f32 %v363_v49, %v368_v53 }
 0x4fa   :  { %v375_v59 = vmul.f32 1.442695, %v373_v55 }
 0x4fb   :  { %v372_v56 = vpop.xlane.xlu1 %371 }
 0x4fc   :  { %v374_v57 = vsub.f32 %v364_v51, %v372_v56 }
 0x4fe   :  { %v377_v60 = vmul.f32 1.442695, %v374_v57 }
 0x500   :  { %3965 = vpow2.f32 %v377_v60 }
 0x501   :  { %3967 = vpow2.f32 %v375_v59 }
 0x50a   :  { %v3966_v61 = vpop.eup %3965 }
 0x50b   :  { %v382_v62 = vsel %vm369_vm6, %v3966_v61, 0.0  ;;  %v3968_v63 = vpop.eup %3967 }
 0x50c   :  { %383 = vadd.xlane.f32.xlu1 %v382_v62  ;;  %v379_v0 = vsel %vm365_vm5, %v3968_v63, 0.0 }
 0x510   :  { %380 = vadd.xlane.f32.xlu1 %v379_v0 }
 0x521   :  { %3867 = vrot.lane.b32.xlu1 %v4284_v34, %s4060_s30 }
 0x599   :  { %v384_v1 = vpop.xlane.xlu1 %383 }
 0x59a   :  { %3969 = vrcp.f32 %v384_v1 }
 0x59d   :  { %v381_v2 = vpop.xlane.xlu1 %380 }
 0x59e   :  { %3971 = vrcp.f32 %v381_v2 }
 0x5a1   :  { %v3868_v4 = vpop.permute.xlu1 %3867 }
 0x5a2   :  { %v3870_v12 = vunpack.i.h.bf16 %v3868_v4  ;;  %v3869_v13 = vunpack.i.l.bf16 %v3868_v4 }
 0x5a4   :  { %v3610_v15 = vpack.c.bf16 %v3870_v12, %v3869_v13  ;;  %v3970_v17 = vpop.eup %3969 }
 0x5a5   :  { %v388_v20 = vmul.f32 %v3970_v17, %v3966_v61 }
 0x5a6   :  { %3612 = vmatprep.subr.msk.bf16.mxu1 %vm4327_vm8, %v3610_v15 }
 0x5a7   :  { %3615 = vmatpush3.bf16.msk.msra.mxu1 %vm4327_vm8, %v3610_v15 }
 0x5a8   :  { %v3972_v18 = vpop.eup %3971  ;;  %3618 = vmatprep.subr.msk.bf16.mxu1 %vm4296_vm3, %v3616_v16 }
 0x5a9   :  { %v387_v19 = vmul.f32 %v3972_v18, %v3968_v63 }
 0x5ab   :  { %3338 = vmatprep.mubr.msk.f32.mxu1 %vm365_vm5, %v387_v19 }
 0x5ac   :  { %3339 = vmatmul.mubr.msk.f32.vlgmr.msra.gmra.mrb[4].mxu1 %vm365_vm5, %v388_v20 }
 0x5ad   :  { %3345 = vmatprep.mubr.msk.f32.mxu1 %vm269_vm2, %v478_v21 }
 0x5b0   :  { %3621 = vmatpush3.bf16.xpose.msk.msra.mxu1 %vm4296_vm3, %v3616_v16 }
 0x5b7   :  { %3346 = vmatmul.mubr.msk.f32.vlgmr.msra.gmra.mrb[6].mxu1 %vm269_vm2, %v480_v22 }
 0x67f   :  { %v4343_v23 = vpop.f32.mrb[4].mxu1 }
 0x680   :  { %v4345_v24 = vpop.f32.mrb[5].mxu1 }
 0x68a   :  { %v3347_v25 = vpop.f32.mrb[6].mxu1 }
 0x68b   :  { %v569_v26 = vmul.f32 0.35355338, %v3347_v25  ;;  %v559_v27 = vpop.f32.mrb[7].mxu1 }
 0x68c   :  { %v568_v28 = vmul.f32 0.35355338, %v559_v27 }
 0x68d   :  { %v571_v29 = vadd.f32 %v569_v26, %v4312_v43 }
 0x68e   :  { %v570_v30 = vadd.f32 %v568_v28, %v4316_v46 }
 0x68f   :  { %v575_v32 = vsel %vm369_vm6, %v571_v29, -inf }
 0x690   :  { %576 = vmax.xlane.f32.xlu0 %v575_v32  ;;  %v572_v35 = vsel %vm365_vm5, %v570_v30, -inf }
 0x691   :  { %573 = vmax.xlane.f32.xlu1 %v572_v35 }
 0x6a2   :  { %3877 = vrot.lane.b32.xlu1 %v4284_v34, %s4062_s9 }
 0x6a6   :  { %3887 = vrot.lane.b32.xlu1 %v4284_v34, %s4063_s10 }
 0x6aa   :  { %682 = vrot.lane.b32.xlu1 %v4278_v33, %s4064_s0 }
 0x6ae   :  { %684 = vrot.lane.b32.xlu1 %v4276_v31, %s4064_s0 }
 0x6b2   :  { %889 = vrot.lane.b32.xlu1 %v4276_v31, %s4065_s1 }
 0x71d   :  { %v577_v36 = vpop.xlane.xlu0 %576 }
 0x71e   :  { %v579_v37 = vsub.f32 %v571_v29, %v577_v36  ;;  %v574_v39 = vpop.xlane.xlu1 %573 }
 0x71f   :  { %v578_v40 = vsub.f32 %v570_v30, %v574_v39 }
 0x720   :  { %v582_v41 = vmul.f32 1.442695, %v579_v37 }
 0x721   :  { %v580_v42 = vmul.f32 1.442695, %v578_v40 }
 0x722   :  { %3973 = vpow2.f32 %v582_v41  ;;  %v3878_v44 = vpop.permute.xlu1 %3877 }
 0x723   :  { %v3880_v45 = vunpack.i.h.bf16 %v3878_v44  ;;  %v3879_v47 = vunpack.i.l.bf16 %v3878_v44  ;;  %3975 = vpow2.f32 %v580_v42 }
 0x725   :  { %v3622_v48 = vpack.c.bf16 %v3880_v45, %v3879_v47 }
 0x726   :  { %v3888_v49 = vpop.permute.xlu1 %3887 }
 0x727   :  { %v3890_v50 = vunpack.i.h.bf16 %v3888_v49  ;;  %v3889_v51 = vunpack.i.l.bf16 %v3888_v49  ;;  %3624 = vmatprep.subr.msk.bf16.mxu1 %vm4327_vm8, %v3622_v48 }
 0x728   :  { %3627 = vmatpush3.bf16.msk.msra.mxu1 %vm4327_vm8, %v3622_v48 }
 0x729   :  { %v3640_v31 = vpack.c.bf16 %v3890_v50, %v3889_v51 }
 0x72a   :  { %v683_v52 = vpop.permute.xlu1 %682 }
 0x72b   :  { %3359 = vmatprep.mubr.msk.f32.mxu0 %vm269_vm2, %v683_v52  ;;  %3642 = vmatprep.subr.msk.bf16.mxu1 %vm4296_vm3, %v3640_v31 }
 0x72c   :  { %v3974_v53 = vpop.eup %3973 }
 0x72d   :  { %v587_v55 = vsel %vm369_vm6, %v3974_v53, 0.0  ;;  %v3976_v56 = vpop.eup %3975 }
 0x72e   :  { %588 = vadd.xlane.f32.xlu0 %v587_v55  ;;  %v584_v57 = vsel %vm365_vm5, %v3976_v56, 0.0  ;;  %v685_v5 = vpop.permute.xlu1 %684 }
 0x732   :  { %585 = vadd.xlane.f32.xlu0 %v584_v57  ;;  %v890_v10 = vpop.permute.xlu1 %889 }
 0x748   :  { %3882 = vrot.lane.b32.xlu0 %v4284_v34, %s4066_s11 }
 0x74c   :  { %887 = vrot.lane.b32.xlu0 %v4278_v33, %s4065_s1 }
 0x7bb   :  { %v589_v59 = vpop.xlane.xlu0 %588 }
 0x7bc   :  { %3977 = vrcp.f32 %v589_v59 }
 0x7bf   :  { %v586_v60 = vpop.xlane.xlu0 %585 }
 0x7c0   :  { %3979 = vrcp.f32 %v586_v60  ;;  %v3906_v60 = vpack.i.bf16 %v4261_v11, %v4252_v8 }
 0x7c3   :  { %v3883_v61 = vpop.permute.xlu0 %3882 }
 0x7c4   :  { %v3885_v62 = vunpack.i.h.bf16 %v3883_v61  ;;  %v3884_v63 = vunpack.i.l.bf16 %v3883_v61 }
 0x7c6   :  { %v3628_v0 = vpack.c.bf16 %v3885_v62, %v3884_v63  ;;  %v3978_v1 = vpop.eup %3977 }
 0x7c7   :  { %v593_v4 = vmul.f32 %v3978_v1, %v3974_v53  ;;  %v888_v33 = vpop.permute.xlu0 %887 }
 0x7c8   :  { %3630 = vmatprep.subr.msk.bf16.mxu0 %vm4296_vm3, %v3628_v0 }
 0x7c9   :  { %3633 = vmatpush3.bf16.xpose.msk.msra.mxu0 %vm4296_vm3, %v3628_v0 }
 0x7ca   :  { %v3980_v2 = vpop.eup %3979 }
 0x7cb   :  { %v592_v3 = vmul.f32 %v3980_v2, %v3976_v56 }
 0x7cd   :  { %3352 = vmatprep.mubr.msk.f32.mxu1 %vm365_vm5, %v592_v3 }
 0x7ce   :  { %3353 = vmatmul.mubr.msk.f32.vlgmr.msra.gmra.mrb[8].mxu1 %vm365_vm5, %v593_v4 }
 0x7cf   :  { %3645 = vmatpush3.bf16.xpose.msk.msra.mxu1 %vm4296_vm3, %v3640_v31  ;;  %3373 = vmatprep.mubr.msk.f32.mxu1 %vm269_vm2, %v888_v33 }
 0x7d0   :  { %3360 = vmatmul.mubr.msk.f32.vlgmr.msra.gmra.mrb[4].mxu0 %vm269_vm2, %v685_v5 }
 0x7d6   :  { %3374 = vmatmul.mubr.msk.f32.vlgmr.msra.gmra.mrb[10].mxu1 %vm269_vm2, %v890_v10 }
 0x8a1   :  { %v3354_v12 = vpop.f32.mrb[8].mxu1 }
 0x8a2   :  { %v673_v13 = vpop.f32.mrb[9].mxu1 }
 0x8a3   :  { %v3361_v15 = vpop.f32.mrb[4].mxu0 }
 0x8a4   :  { %v774_v16 = vmul.f32 0.35355338, %v3361_v15  ;;  %v764_v17 = vpop.f32.mrb[5].mxu0 }
 0x8a5   :  { %v773_v18 = vmul.f32 0.35355338, %v764_v17 }
 0x8a6   :  { %v776_v19 = vadd.f32 %v774_v16, %v4312_v43 }
 0x8a7   :  { %v775_v20 = vadd.f32 %v773_v18, %v4316_v46 }
 0x8a8   :  { %v780_v21 = vsel %vm369_vm6, %v776_v19, -inf }
 0x8a9   :  { %v3375_v22 = vpop.f32.mrb[10].mxu1  ;;  %781 = vmax.xlane.f32.xlu1 %v780_v21  ;;  %v777_v25 = vsel %vm365_vm5, %v775_v20, -inf }
 0x8aa   :  { %v969_v26 = vpop.f32.mrb[11].mxu1  ;;  %778 = vmax.xlane.f32.xlu0 %v777_v25  ;;  %v979_v27 = vmul.f32 0.35355338, %v3375_v22 }
 0x8ab   :  { %v978_v28 = vmul.f32 0.35355338, %v969_v26 }
 0x8ac   :  { %v981_v32 = vadd.f32 %v979_v27, %v4312_v43 }
 0x8ad   :  { %v980_v29 = vadd.f32 %v978_v28, %v4316_v46 }
 0x8ae   :  { %v985_v35 = vsel %vm369_vm6, %v981_v32, -inf }
 0x8af   :  { %v982_v30 = vsel %vm365_vm5, %v980_v29, -inf }
 0x8b0   :  { %983 = vmax.xlane.f32.xlu0 %v982_v30 }
 0x8b4   :  { %986 = vmax.xlane.f32.xlu0 %v985_v35 }
 0x936   :  { %v782_v36 = vpop.xlane.xlu1 %781 }
 0x937   :  { %v784_v37 = vsub.f32 %v776_v19, %v782_v36  ;;  %v779_v39 = vpop.xlane.xlu0 %778 }
 0x938   :  { %v783_v40 = vsub.f32 %v775_v20, %v779_v39 }
 0x939   :  { %v787_v41 = vmul.f32 1.442695, %v784_v37 }
 0x93a   :  { %v785_v42 = vmul.f32 1.442695, %v783_v40 }
 0x93b   :  { %3981 = vpow2.f32 %v787_v41 }
 0x93c   :  { %3983 = vpow2.f32 %v785_v42 }
 0x93d   :  { %v984_v44 = vpop.xlane.xlu0 %983 }
 0x93e   :  { %v988_v45 = vsub.f32 %v980_v29, %v984_v44 }
 0x940   :  { %v990_v47 = vmul.f32 1.442695, %v988_v45 }
 0x941   :  { %v987_v48 = vpop.xlane.xlu0 %986 }
 0x942   :  { %3985 = vpow2.f32 %v990_v47  ;;  %v989_v49 = vsub.f32 %v981_v32, %v987_v48 }
 0x944   :  { %v992_v50 = vmul.f32 1.442695, %v989_v49 }
 0x945   :  { %v3982_v51 = vpop.eup %3981 }
 0x946   :  { %v3984_v31 = vpop.eup %3983  ;;  %3987 = vpow2.f32 %v992_v50  ;;  %v792_v52 = vsel %vm369_vm6, %v3982_v51, 0.0 }
 0x947   :  { %793 = vadd.xlane.f32.xlu1 %v792_v52  ;;  %v789_v53 = vsel %vm365_vm5, %v3984_v31, 0.0 }
 0x948   :  { %790 = vadd.xlane.f32.xlu0 %v789_v53 }
 0x94c   :  { %v3986_v55 = vpop.eup %3985 }
 0x94d   :  { %v994_v56 = vsel %vm365_vm5, %v3986_v55, 0.0 }
 0x94e   :  { %995 = vadd.xlane.f32.xlu0 %v994_v56 }
 0x950   :  { %v3988_v57 = vpop.eup %3987 }
 0x951   :  { %v997_v59 = vsel %vm369_vm6, %v3988_v57, 0.0 }
 0x952   :  { %998 = vadd.xlane.f32.xlu1 %v997_v59 }
 0x963   :  { %3897 = vrot.lane.b32.xlu1 %v4284_v34, %s4067_s12 }
 0x964   :  { %3892 = vrot.lane.b32.xlu0 %v4284_v34, %s4068_s13 }
 0x967   :  { %3902 = vrot.lane.b32.xlu1 %v3901_v9, %s4069_s14 }
 0x968   :  { %1094 = vrot.lane.b32.xlu0 %v673_v13, %s4070_s15 }
 0x96b   :  { %3907 = vrot.lane.b32.xlu1 %v3906_v60, %s4069_s14 }
 0x96f   :  { %1096 = vrot.lane.b32.xlu1 %v3354_v12, %s4070_s15 }
 0x9d4   :  { %v794_v62 = vpop.xlane.xlu1 %793 }
 0x9d5   :  { %v791_v61 = vpop.xlane.xlu0 %790 }
 0x9d6   :  { %3989 = vrcp.f32 %v791_v61 }
 0x9d7   :  { %3991 = vrcp.f32 %v794_v62 }
 0x9db   :  { %v996_v34 = vpop.xlane.xlu0 %995 }
 0x9dc   :  { %3993 = vrcp.f32 %v996_v34 }
 0x9df   :  { %v999_v63 = vpop.xlane.xlu1 %998  ;;  %v3893_v0 = vpop.permute.xlu0 %3892 }
 0x9e0   :  { %v3990_v6 = vpop.eup %3989  ;;  %3995 = vrcp.f32 %v999_v63  ;;  %v3895_v7 = vunpack.i.h.bf16 %v3893_v0  ;;  %v3894_v9 = vunpack.i.l.bf16 %v3893_v0  ;;  %v1258_v63 = vld [vmem:[%s4959_s3] sm:$0xff]  ;;  %v1259_v0 = vld [vmem:[%s4959_s3 + $0x8] sm:$0xff] }
 0x9e1   :  { %v797_v8 = vmul.f32 %v3990_v6, %v3984_v31  ;;  %v3992_v1 = vpop.eup %3991  ;;  %v3660_v6 = vpack.c.bf16 %v1259_v0, %v1258_v63 }
 0x9e2   :  { %v3634_v11 = vpack.c.bf16 %v3895_v7, %v3894_v9  ;;  %v798_v5 = vmul.f32 %v3992_v1, %v3982_v51  ;;  %v1260_v7 = vld [vmem:[%s4959_s3 + $0x10] sm:$0xff]  ;;  %v1261_v9 = vld [vmem:[%s4959_s3 + $0x18] sm:$0xff] }
 0x9e3   :  { %v3898_v2 = vpop.permute.xlu1 %3897  ;;  %3366 = vmatprep.mubr.msk.f32.mxu0 %vm365_vm5, %v797_v8  ;;  %v1095_v32 = vpop.permute.xlu0 %1094  ;;  %3661 = vmatprep.subr.bf16.mxu1 %v3660_v6  ;;  %v3664_v8 = vpack.c.bf16 %v1261_v9, %v1260_v7 }
 0x9e4   :  { %v3900_v3 = vunpack.i.h.bf16 %v3898_v2  ;;  %v3899_v4 = vunpack.i.l.bf16 %v3898_v2  ;;  %3636 = vmatprep.subr.msk.bf16.mxu0 %vm4327_vm8, %v3634_v11  ;;  %v1116_v37 = vsel %vm269_vm2, %v4345_v24, %v1095_v32  ;;  %v1223_v24 = vld [vmem:[%s4958_s7 + $0x3] ss:$0 sm:$0xff]  ;;  %3663 = vmatpush3.bf16.msra.mxu1 %v3660_v6 }
 0x9e5   :  { %3639 = vmatpush3.bf16.msk.msra.mxu0 %vm4327_vm8, %v3634_v11  ;;  %3665 = vmatprep.subr.bf16.mxu1 %v3664_v8 }
 0x9e6   :  { %v3994_v33 = vpop.eup %3993  ;;  %v3646_v10 = vpack.c.bf16 %v3900_v3, %v3899_v4 }
 0x9e7   :  { %v3903_v12 = vpop.permute.xlu1 %3902  ;;  %v1002_v13 = vmul.f32 %v3994_v33, %v3986_v55 }
 0x9e8   :  { %v3905_v15 = vunpack.i.h.bf16 %v3903_v12  ;;  %v3904_v16 = vunpack.i.l.bf16 %v3903_v12  ;;  %3367 = vmatmul.mubr.msk.f32.vlgmr.msra.gmra.mrb[6].mxu0 %vm365_vm5, %v798_v5  ;;  %3648 = vmatprep.subr.msk.bf16.mxu0 %vm4327_vm8, %v3646_v10 }
 0x9e9   :  { %3651 = vmatpush3.bf16.msk.msra.mxu0 %vm4327_vm8, %v3646_v10  ;;  %3380 = vmatprep.mubr.msk.f32.mxu0 %vm365_vm5, %v1002_v13  ;;  %v1226_v10 = vld [vmem:[%s4958_s7 + $0x4] ss:$0 sm:$0xff]  ;;  %v1227_v13 = vld [vmem:[%s4958_s7 + $0x5] ss:$0 sm:$0xff] }
 0x9ea   :  { %v3996_v17 = vpop.eup %3995  ;;  %v3652_v18 = vpack.c.bf16 %v3905_v15, %v3904_v16  ;;  %3667 = vmatpush3.bf16.msra.mxu1 %v3664_v8 }
 0x9eb   :  { %v1003_v19 = vmul.f32 %v3996_v17, %v3988_v57  ;;  %v3908_v20 = vpop.permute.xlu1 %3907 }
 0x9ec   :  { %v3910_v21 = vunpack.i.h.bf16 %v3908_v20  ;;  %v3909_v22 = vunpack.i.l.bf16 %v3908_v20  ;;  %3653 = vmatprep.subr.bf16.mxu0 %v3652_v18 }
 0x9ed   :  { %3381 = vmatmul.mubr.msk.f32.vlgmr.msra.gmra.mrb[8].mxu0 %vm365_vm5, %v1003_v19 }
 0x9ee   :  { %v3656_v25 = vpack.c.bf16 %v3910_v21, %v3909_v22  ;;  %3655 = vmatpush3.bf16.msra.mxu0 %v3652_v18  ;;  %v1362_v21 = vld [vmem:[%s4960_s4] sm:$0xff]  ;;  %v1363_v22 = vld [vmem:[%s4960_s4 + $0x8] sm:$0xff] }
 0x9ef   :  { %v1097_v30 = vpop.permute.xlu1 %1096 }
 0x9f0   :  { %3657 = vmatprep.subr.bf16.mxu0 %v3656_v25  ;;  %v1117_v40 = vsel %vm269_vm2, %v4343_v23, %v1097_v30  ;;  %v1367_v30 = vld [vmem:[%s4960_s4 + $0x28] sm:$0xff] }
 0x9f2   :  { %3659 = vmatpush3.bf16.msra.mxu0 %v3656_v25  ;;  %v3668_v25 = vpack.c.bf16 %v1363_v22, %v1362_v21 }
 0x9f4   :  { %3669 = vmatprep.subr.bf16.mxu0 %v3668_v25 }
 0xabb   :  { %v3368_v26 = vpop.f32.mrb[6].mxu0 }
 0xabc   :  { %1104 = vrot.lane.b32.xlu1 %v3368_v26, %s4071_s16  ;;  %v878_v27 = vpop.f32.mrb[7].mxu0  ;;  %v1364_v26 = vld [vmem:[%s4960_s4 + $0x10] sm:$0xff] }
 0xabd   :  { %1102 = vrot.lane.b32.xlu0 %v878_v27, %s4071_s16  ;;  %v1365_v27 = vld [vmem:[%s4960_s4 + $0x18] sm:$0xff] }
 0xac0   :  { %v3382_v28 = vpop.f32.mrb[8].mxu0 }
 0xac1   :  { %1112 = vrot.lane.b32.xlu1 %v3382_v28, %s4964_s17  ;;  %v1083_v29 = vpop.f32.mrb[9].mxu0  ;;  %v3672_v28 = vpack.c.bf16 %v1365_v27, %v1364_v26 }
 0xac2   :  { %1110 = vrot.lane.b32.xlu0 %v1083_v29, %s4964_s17  ;;  %v1366_v29 = vld [vmem:[%s4960_s4 + $0x20] sm:$0xff] }
 0xac3   :  { %v3676_v32 = vpack.c.bf16 %v1367_v30, %v1366_v29  ;;  %v4544_v29 = vld [vmem:[%s4957_s2 + $0x20] sm:$0xff]  ;;  %v4549_v30 = vld [vmem:[%s4957_s2 + $0x28] sm:$0xff] }
 0xb2e   :  { %v1105_v35 = vpop.permute.xlu1 %1104 }
 0xb2f   :  { %v1103_v36 = vpop.permute.xlu0 %1102  ;;  %v1120_v44 = vsel %vm1118_vm9, %v1117_v40, %v1105_v35  ;;  %v1368_v35 = vld [vmem:[%s4960_s4 + $0x30] sm:$0xff]  ;;  %v1371_v40 = vld [vmem:[%s4960_s4 + $0x48] sm:$0xff] }
 0xb30   :  { %v1119_v41 = vsel %vm1118_vm9, %v1116_v37, %v1103_v36  ;;  %v1369_v36 = vld [vmem:[%s4960_s4 + $0x38] sm:$0xff] }
 0xb31   :  { %v3680_v37 = vpack.c.bf16 %v1369_v36, %v1368_v35  ;;  %v4556_v35 = vld [vmem:[%s4957_s2 + $0x30] sm:$0xff]  ;;  %v4561_v36 = vld [vmem:[%s4957_s2 + $0x38] sm:$0xff] }
 0xb33   :  { %v1113_v39 = vpop.permute.xlu1 %1112 }
 0xb34   :  { %v1111_v42 = vpop.permute.xlu0 %1110  ;;  %v1123_v47 = vsel %vm1121_vm10, %v1120_v44, %v1113_v39  ;;  %v1370_v39 = vld [vmem:[%s4960_s4 + $0x40] sm:$0xff]  ;;  %v1373_v44 = vld [vmem:[%s4960_s4 + $0x58] sm:$0xff] }
 0xb35   :  { %v1122_v45 = vsel %vm1121_vm10, %v1119_v41, %v1111_v42  ;;  %v1372_v41 = vld [vmem:[%s4960_s4 + $0x50] sm:$0xff]  ;;  %v3684_v42 = vpack.c.bf16 %v1371_v40, %v1370_v39 }
 0xb36   :  { %3391 = vmatprep.mubr.msk.f32.mxu0 %vm148_vm0, %v1122_v45  ;;  %v3688_v45 = vpack.c.bf16 %v1373_v44, %v1372_v41 }
 0xb37   :  { %3392 = vmatmul.mubr.msk.f32.vlgmr.msra.gmra.mrb[10].mxu0 %vm148_vm0, %v1123_v47  ;;  %v1374_v47 = vld [vmem:[%s4960_s4 + $0x60] sm:$0xff] }
 0xb38   :  { %3671 = vmatpush3.bf16.msra.mxu0 %v3668_v25 }
 0xb39   :  { %3673 = vmatprep.subr.bf16.mxu0 %v3672_v28 }
 0xb3c   :  { %3675 = vmatpush3.bf16.msra.mxu0 %v3672_v28 }
 0xb3d   :  { %3677 = vmatprep.subr.bf16.mxu0 %v3676_v32 }
 0xb40   :  { %3679 = vmatpush3.bf16.msra.mxu0 %v3676_v32  ;;  %v3700_v32 = vpack.c.bf16 %v4549_v30, %v4544_v29 }
 0xb41   :  { %3681 = vmatprep.subr.bf16.mxu0 %v3680_v37 }
 0xb42   :  { %3701 = vmatprep.subr.bf16.mxu1 %v3700_v32 }
 0xb44   :  { %3683 = vmatpush3.bf16.msra.mxu0 %v3680_v37  ;;  %v3704_v37 = vpack.c.bf16 %v4561_v36, %v4556_v35 }
 0xb45   :  { %3685 = vmatprep.subr.bf16.mxu0 %v3684_v42 }
 0xb48   :  { %3687 = vmatpush3.bf16.msra.mxu0 %v3684_v42 }
 0xb49   :  { %3689 = vmatprep.subr.bf16.mxu0 %v3688_v45 }
 0xb4c   :  { %3691 = vmatpush3.bf16.msra.mxu0 %v3688_v45 }
 0xc0a   :  { %v3393_v48 = vpop.f32.mrb[10].mxu0 }
 0xc0b   :  { %v1222_v23 = vadd.f32 %v3393_v48, %v4231_v58  ;;  %v1212_v49 = vpop.f32.mrb[11].mxu0  ;;  %v1375_v48 = vld [vmem:[%s4960_s4 + $0x68] sm:$0xff] }
 0xc0c   :  { %v1221_v50 = vadd.f32 %v4227_v54, %v1212_v49  ;;  %v1377_v49 = vld [vmem:[%s4960_s4 + $0x78] sm:$0xff] }
 0xc0d   :  { %v4441_v51 = vadd.f32 %v1223_v24, %v1222_v23  ;;  %v1376_v23 = vld [vmem:[%s4960_s4 + $0x70] sm:$0xff] }
 0xc0e   :  { %v4443_v31 = vadd.f32 %v1223_v24, %v1221_v50  ;;  %v3692_v24 = vpack.c.bf16 %v1375_v48, %v1374_v47  ;;  %v3696_v50 = vpack.c.bf16 %v1377_v49, %v1376_v23  ;;  %v1463_v48 = vld [vmem:[%s4958_s7 + $0x10] ss:$0 sm:$0xff] }
 0xc0f   :  { %v1231_v52 = vsel %vm152_vm1, %v4441_v51, 0.0 }
 0xc10   :  { %1232 = vadd.xlane.f32.xlu1 %v1231_v52  ;;  %v1228_v53 = vsel %vm148_vm0, %v4443_v31, 0.0  ;;  %3693 = vmatprep.subr.bf16.mxu0 %v3692_v24  ;;  %v1262_v52 = vld [vmem:[%s4958_s7 + $0x6] ss:$0 sm:$0xff] }
 0xc11   :  { %1229 = vadd.xlane.f32.xlu0 %v1228_v53  ;;  %3695 = vmatpush3.bf16.msra.mxu0 %v3692_v24 }
 0xc12   :  { %3697 = vmatprep.subr.bf16.mxu0 %v3696_v50 }
 0xc15   :  { %3699 = vmatpush3.bf16.msra.mxu0 %v3696_v50  ;;  %v1464_v50 = vld [vmem:[%s4958_s7 + $0x11] ss:$0 sm:$0xff] }
 0xc9d   :  { %v1233_v55 = vpop.xlane.xlu1 %1232 }
 0xc9e   :  { %v1235_v56 = vmul.f32 0.03125, %v1233_v55  ;;  %v1230_v57 = vpop.xlane.xlu0 %1229 }
 0xc9f   :  { %v1234_v59 = vmul.f32 0.03125, %v1230_v57 }
 0xca0   :  { %v1237_v58 = vsub.f32 %v4441_v51, %v1235_v56 }
 0xca1   :  { %v1236_v54 = vsub.f32 %v4443_v31, %v1234_v59 }
 0xca2   :  { %v1239_v62 = vmul.f32 %v1237_v58, %v1237_v58 }
 0xca3   :  { %v1238_v60 = vmul.f32 %v1236_v54, %v1236_v54 }
 0xca4   :  { %v1243_v34 = vsel %vm152_vm1, %v1239_v62, 0.0 }
 0xca5   :  { %v1240_v61 = vsel %vm148_vm0, %v1238_v60, 0.0 }
 0xca6   :  { %1241 = vadd.xlane.f32.xlu0 %v1240_v61 }
 0xcaa   :  { %1244 = vadd.xlane.f32.xlu0 %v1243_v34 }
 0xd33   :  { %v1242_v11 = vpop.xlane.xlu0 %1241 }
 0xd34   :  { %v1246_v1 = vmul.f32 0.03125, %v1242_v11 }
 0xd36   :  { %v1248_v2 = vadd.f32 1e-12, %v1246_v1 }
 0xd37   :  { %v1245_v3 = vpop.xlane.xlu0 %1244 }
 0xd38   :  { %3997 = vrsqrt.f32 %v1248_v2  ;;  %v1247_v4 = vmul.f32 0.03125, %v1245_v3 }
 0xd3a   :  { %v1249_v33 = vadd.f32 1e-12, %v1247_v4 }
 0xd3c   :  { %3999 = vrsqrt.f32 %v1249_v33 }
 0xd42   :  { %v3998_v5 = vpop.eup %3997 }
 0xd43   :  { %v1252_v12 = vmul.f32 %v3998_v5, %v1236_v54  ;;  %v1455_v5 = vld [vmem:[%s4958_s7 + $0x7] ss:$0 sm:$0xff] }
 0xd45   :  { %v1254_v15 = vmul.f32 %v1252_v12, %v1226_v10 }
 0xd46   :  { %v4000_v16 = vpop.eup %3999 }
 0xd47   :  { %v1253_v17 = vmul.f32 %v4000_v16, %v1237_v58  ;;  %v1256_v18 = vadd.f32 %v1254_v15, %v1227_v13 }
 0xd49   :  { %v1255_v19 = vmul.f32 %v1253_v17, %v1226_v10  ;;  %3402 = vmatprep.mubr.msk.f32.mxu1 %vm148_vm0, %v1256_v18 }
 0xd4b   :  { %v1257_v20 = vadd.f32 %v1255_v19, %v1227_v13 }
 0xd4d   :  { %3403 = vmatmul.mubr.msk.f32.vlgmr.msra.gmra.mrb[12].mxu1 %vm148_vm0, %v1257_v20 }
 0xd4e   :  { %3703 = vmatpush3.bf16.msra.mxu1 %v3700_v32 }
 0xd4f   :  { %3705 = vmatprep.subr.bf16.mxu1 %v3704_v37 }
 0xd52   :  { %3707 = vmatpush3.bf16.msra.mxu1 %v3704_v37 }
 0xe20   :  { %v3404_v53 = vpop.f32.mrb[12].mxu1 }
 0xe21   :  { %v1341_v55 = vadd.f32 %v3404_v53, %v1262_v52  ;;  %v1335_v56 = vpop.f32.mrb[13].mxu1 }
 0xe22   :  { %v1336_v57 = vadd.f32 %v1335_v56, %v1262_v52 }
 0xe23   :  { %v1345_v59 = vmul.f32 %v1341_v55, %v1341_v55 }
 0xe24   :  { %v1344_v58 = vmul.f32 %v1336_v57, %v1336_v57 }
 0xe25   :  { %v1347_v54 = vmul.f32 %v1345_v59, %v1341_v55 }
 0xe26   :  { %v1346_v60 = vmul.f32 %v1344_v58, %v1336_v57 }
 0xe27   :  { %v1349_v61 = vmul.f32 0.044715, %v1347_v54 }
 0xe28   :  { %v1348_v62 = vmul.f32 0.044715, %v1346_v60 }
 0xe29   :  { %v1351_v34 = vadd.f32 %v1349_v61, %v1341_v55 }
 0xe2a   :  { %v1350_v63 = vadd.f32 %v1348_v62, %v1336_v57 }
 0xe2b   :  { %v1353_v0 = vmul.f32 0.7978846, %v1351_v34 }
 0xe2c   :  { %v1352_v6 = vmul.f32 0.7978846, %v1350_v63 }
 0xe2d   :  { %4001 = vtanh.f32 %v1353_v0 }
 0xe2e   :  { %4003 = vtanh.f32 %v1352_v6 }
 0xe37   :  { %v4002_v7 = vpop.eup %4001 }
 0xe38   :  { %v4004_v9 = vpop.eup %4003  ;;  %v1357_v8 = vadd.f32 1.0, %v4002_v7 }
 0xe39   :  { %v1356_v11 = vadd.f32 1.0, %v4004_v9 }
 0xe3a   :  { %v1359_v1 = vmul.f32 0.5, %v1357_v8 }
 0xe3b   :  { %v1358_v2 = vmul.f32 0.5, %v1356_v11 }
 0xe3c   :  { %v1361_v4 = vmul.f32 %v1359_v1, %v1341_v55 }
 0xe3d   :  { %v1360_v3 = vmul.f32 %v1358_v2, %v1336_v57  ;;  %v1495_v57 = vld [vmem:[%s4958_s7 + $0x12] ss:$0 sm:$0xff] }
 0xe3f   :  { %3437 = vmatprep.mubr.f32.mxu0 %v1360_v3 }
 0xe40   :  { %3438 = vmatmul.mubr.f32.vlgmr.msra.gmra.mrb[12].mxu0 %v1361_v4 }
 0xf13   :  { %v3439_v33 = vpop.f32.mrb[12].mxu0 }
 0xf14   :  { %v1454_v10 = vadd.f32 %v3439_v33, %v4441_v51  ;;  %v1444_v12 = vpop.f32.mrb[13].mxu0 }
 0xf15   :  { %v1453_v13 = vadd.f32 %v1444_v12, %v4443_v31 }
 0xf16   :  { %v4529_v15 = vadd.f32 %v1455_v5, %v1454_v10 }
 0xf17   :  { %v4531_v16 = vadd.f32 %v1455_v5, %v1453_v13 }
 0xf18   :  { %v1468_v17 = vsel %vm152_vm1, %v4529_v15, 0.0 }
 0xf19   :  { %1469 = vadd.xlane.f32.xlu1 %v1468_v17  ;;  %v1465_v18 = vsel %vm148_vm0, %v4531_v16, 0.0 }
 0xf1a   :  { %1466 = vadd.xlane.f32.xlu0 %v1465_v18 }
 0xfa6   :  { %v1470_v19 = vpop.xlane.xlu1 %1469 }
 0xfa7   :  { %v1472_v20 = vmul.f32 0.03125, %v1470_v19  ;;  %v1467_v21 = vpop.xlane.xlu0 %1466 }
 0xfa8   :  { %v1471_v22 = vmul.f32 0.03125, %v1467_v21 }
 0xfa9   :  { %v1474_v51 = vsub.f32 %v4529_v15, %v1472_v20 }
 0xfaa   :  { %v1473_v31 = vsub.f32 %v4531_v16, %v1471_v22 }
 0xfab   :  { %v1476_v25 = vmul.f32 %v1474_v51, %v1474_v51 }
 0xfac   :  { %v1475_v26 = vmul.f32 %v1473_v31, %v1473_v31 }
 0xfad   :  { %v1480_v27 = vsel %vm152_vm1, %v1476_v25, 0.0 }
 0xfae   :  { %1481 = vadd.xlane.f32.xlu1 %v1480_v27  ;;  %v1477_v28 = vsel %vm148_vm0, %v1475_v26, 0.0 }
 0xfaf   :  { %1478 = vadd.xlane.f32.xlu0 %v1477_v28 }
0x103b   :  { %v1482_v39 = vpop.xlane.xlu1 %1481 }
0x103c   :  { %v1484_v40 = vmul.f32 0.03125, %v1482_v39  ;;  %v1479_v41 = vpop.xlane.xlu0 %1478 }
0x103d   :  { %v1483_v42 = vmul.f32 0.03125, %v1479_v41 }
0x103e   :  { %v1486_v44 = vadd.f32 1e-12, %v1484_v40 }
0x103f   :  { %v1485_v45 = vadd.f32 1e-12, %v1483_v42 }
0x1040   :  { %4005 = vrsqrt.f32 %v1486_v44 }
0x1041   :  { %4007 = vrsqrt.f32 %v1485_v45 }
0x104a   :  { %v4006_v47 = vpop.eup %4005 }
0x104b   :  { %v4008_v24 = vpop.eup %4007  ;;  %v1490_v23 = vmul.f32 %v4006_v47, %v1474_v51 }
0x104c   :  { %v1489_v49 = vmul.f32 %v4008_v24, %v1473_v31 }
0x104d   :  { %v1492_v52 = vmul.f32 %v1490_v23, %v1463_v48 }
0x104e   :  { %v1491_v53 = vmul.f32 %v1489_v49, %v1463_v48 }
0x104f   :  { %v1494_v56 = vadd.f32 %v1492_v52, %v1464_v50 }
0x1050   :  { %v1493_v55 = vadd.f32 %v1491_v53, %v1464_v50 }
0x1052   :  { %3448 = vmatprep.mubr.msk.f32.mxu1 %vm148_vm0, %v1493_v55 }
0x1053   :  { %3449 = vmatmul.mubr.msk.f32.vlgmr.msra.gmra.mrb[14].mxu1 %vm148_vm0, %v1494_v56 }
0x1126   :  { %v3450_v59 = vpop.f32.mrb[14].mxu1 }
0x1127   :  { %v4576_v58 = vadd.f32 %v3450_v59, %v1495_v57  ;;  %v1568_v54 = vpop.f32.mrb[15].mxu1 }
0x1128   :  { %v4578_v60 = vadd.f32 %v1568_v54, %v1495_v57 }
0x112a   :  { %3455 = vmatprep.mubr.msk.f32.mxu1 %vm269_vm2, %v4578_v60  ;;  %v4584_v61 = vpack.i.bf16 %v4576_v58, %v4578_v60 }
0x112c   :  { %3912 = vrot.lane.b32.xlu0 %v4584_v61, %s4057_s23  ;;  %s4970_s23 = smov 24  }
0x1130   :  { %3922 = vrot.lane.b32.xlu0 %v4584_v61, %s4058_s24 }
0x1134   :  { %1780 = vrot.lane.b32.xlu0 %v4578_v60, %s4059_s25 }
0x1138   :  { %3927 = vrot.lane.b32.xlu0 %v4584_v61, %s4066_s11 }
0x113c   :  { %1985 = vrot.lane.b32.xlu0 %v4578_v60, %s4064_s0 }
0x119e   :  { %v3913_v62 = vpop.permute.xlu0 %3912 }
0x119f   :  { %v3915_v34 = vunpack.i.h.bf16 %v3913_v62  ;;  %v3914_v63 = vunpack.i.l.bf16 %v3913_v62 }
0x11a1   :  { %v3708_v0 = vpack.c.bf16 %v3915_v34, %v3914_v63 }
0x11a2   :  { %v3923_v6 = vpop.permute.xlu0 %3922 }
0x11a3   :  { %3710 = vmatprep.subr.msk.bf16.mxu1 %vm4296_vm3, %v3708_v0  ;;  %v3925_v31 = vunpack.i.h.bf16 %v3923_v6  ;;  %v3924_v26 = vunpack.i.l.bf16 %v3923_v6 }
0x11a4   :  { %3713 = vmatpush3.bf16.xpose.msk.msra.mxu1 %vm4296_vm3, %v3708_v0 }
0x11a5   :  { %v3720_v37 = vpack.c.bf16 %v3925_v31, %v3924_v26 }
0x11a6   :  { %v1781_v7 = vpop.permute.xlu0 %1780 }
0x11aa   :  { %v3928_v9 = vpop.permute.xlu0 %3927 }
0x11ab   :  { %v3930_v8 = vunpack.i.h.bf16 %v3928_v9  ;;  %v3929_v11 = vunpack.i.l.bf16 %v3928_v9  ;;  %3456 = vmatmul.mubr.msk.f32.vlgmr.msra.gmra.mrb[16].mxu1 %vm269_vm2, %v4576_v58 }
0x11ad   :  { %v3732_v1 = vpack.c.bf16 %v3930_v8, %v3929_v11 }
0x11ae   :  { %v1986_v2 = vpop.permute.xlu0 %1985 }
0x11af   :  { %3734 = vmatprep.subr.msk.bf16.mxu0 %vm4296_vm3, %v3732_v1  ;;  %3483 = vmatprep.mubr.msk.f32.mxu0 %vm269_vm2, %v1986_v2 }
0x11b0   :  { %3737 = vmatpush3.bf16.xpose.msk.msra.mxu0 %vm4296_vm3, %v3732_v1 }
0x127e   :  { %v3457_v3 = vpop.f32.mrb[16].mxu1 }
0x127f   :  { %v1657_v4 = vpop.f32.mrb[17].mxu1  ;;  %v1667_v33 = vmul.f32 0.35355338, %v3457_v3 }
0x1280   :  { %v1666_v5 = vmul.f32 0.35355338, %v1657_v4 }
0x1281   :  { %v1669_v13 = vadd.f32 %v1667_v33, %v4312_v43 }
0x1282   :  { %v1668_v10 = vadd.f32 %v1666_v5, %v4316_v46 }
0x1283   :  { %v1673_v17 = vsel %vm369_vm6, %v1669_v13, -inf }
0x1284   :  { %v1670_v12 = vsel %vm365_vm5, %v1668_v10, -inf }
0x1285   :  { %1671 = vmax.xlane.f32.xlu1 %v1670_v12 }
0x1289   :  { %1674 = vmax.xlane.f32.xlu1 %v1673_v17 }
0x129a   :  { %3917 = vrot.lane.b32.xlu1 %v4584_v61, %s4060_s30 }
0x1312   :  { %v1672_v18 = vpop.xlane.xlu1 %1671 }
0x1313   :  { %v1676_v19 = vsub.f32 %v1668_v10, %v1672_v18 }
0x1315   :  { %v1678_v22 = vmul.f32 1.442695, %v1676_v19 }
0x1316   :  { %v1675_v20 = vpop.xlane.xlu1 %1674 }
0x1317   :  { %v1677_v21 = vsub.f32 %v1669_v13, %v1675_v20 }
0x1319   :  { %v1680_v51 = vmul.f32 1.442695, %v1677_v21 }
0x131a   :  { %v3918_v25 = vpop.permute.xlu1 %3917 }
0x131b   :  { %4009 = vpow2.f32 %v1680_v51  ;;  %v3920_v27 = vunpack.i.h.bf16 %v3918_v25  ;;  %v3919_v28 = vunpack.i.l.bf16 %v3918_v25 }
0x131c   :  { %4011 = vpow2.f32 %v1678_v22 }
0x131d   :  { %v3714_v32 = vpack.c.bf16 %v3920_v27, %v3919_v28 }
0x131f   :  { %3716 = vmatprep.subr.msk.bf16.mxu1 %vm4327_vm8, %v3714_v32 }
0x1320   :  { %3719 = vmatpush3.bf16.msk.msra.mxu1 %vm4327_vm8, %v3714_v32 }
0x1321   :  { %3722 = vmatprep.subr.msk.bf16.mxu1 %vm4296_vm3, %v3720_v37 }
0x1325   :  { %v4010_v39 = vpop.eup %4009 }
0x1326   :  { %v1685_v40 = vsel %vm369_vm6, %v4010_v39, 0.0  ;;  %v4012_v41 = vpop.eup %4011 }
0x1327   :  { %1686 = vadd.xlane.f32.xlu1 %v1685_v40  ;;  %v1682_v42 = vsel %vm365_vm5, %v4012_v41, 0.0 }
0x132b   :  { %1683 = vadd.xlane.f32.xlu1 %v1682_v42 }
0x133c   :  { %1782 = vrot.lane.b32.xlu1 %v4576_v58, %s4059_s25 }
0x1340   :  { %1987 = vrot.lane.b32.xlu1 %v4576_v58, %s4064_s0 }
0x13b4   :  { %v1687_v44 = vpop.xlane.xlu1 %1686 }
0x13b5   :  { %4013 = vrcp.f32 %v1687_v44 }
0x13b8   :  { %v1684_v45 = vpop.xlane.xlu1 %1683 }
0x13b9   :  { %4015 = vrcp.f32 %v1684_v45 }
0x13bc   :  { %v1783_v47 = vpop.permute.xlu1 %1782 }
0x13bf   :  { %v4014_v24 = vpop.eup %4013 }
0x13c0   :  { %v1988_v48 = vpop.permute.xlu1 %1987  ;;  %v1691_v50 = vmul.f32 %v4014_v24, %v4010_v39 }
0x13c1   :  { %3484 = vmatmul.mubr.msk.f32.vlgmr.msra.gmra.mrb[14].mxu0 %vm269_vm2, %v1988_v48 }
0x13c3   :  { %v4016_v23 = vpop.eup %4015 }
0x13c4   :  { %v1690_v49 = vmul.f32 %v4016_v23, %v4012_v41 }
0x13c6   :  { %3462 = vmatprep.mubr.msk.f32.mxu1 %vm365_vm5, %v1690_v49 }
0x13c7   :  { %3463 = vmatmul.mubr.msk.f32.vlgmr.msra.gmra.mrb[18].mxu1 %vm365_vm5, %v1691_v50 }
0x13c8   :  { %3725 = vmatpush3.bf16.xpose.msk.msra.mxu1 %vm4296_vm3, %v3720_v37  ;;  %3469 = vmatprep.mubr.msk.f32.mxu1 %vm269_vm2, %v1781_v7 }
0x13cf   :  { %3470 = vmatmul.mubr.msk.f32.vlgmr.msra.gmra.mrb[20].mxu1 %vm269_vm2, %v1783_v47 }
0x1494   :  { %v3485_v52 = vpop.f32.mrb[14].mxu0 }
0x1495   :  { %v2067_v53 = vpop.f32.mrb[15].mxu0  ;;  %v2077_v7 = vmul.f32 0.35355338, %v3485_v52 }
0x1496   :  { %v2076_v62 = vmul.f32 0.35355338, %v2067_v53 }
0x1497   :  { %v2079_v1 = vadd.f32 %v2077_v7, %v4312_v43 }
0x1498   :  { %v2078_v8 = vadd.f32 %v2076_v62, %v4316_v46 }
0x1499   :  { %v2083_v2 = vsel %vm369_vm6, %v2079_v1, -inf }
0x149a   :  { %v4632_v55 = vpop.f32.mrb[18].mxu1  ;;  %v2080_v11 = vsel %vm365_vm5, %v2078_v8, -inf }
0x149b   :  { %v4634_v56 = vpop.f32.mrb[19].mxu1 }
0x14a2   :  { %v3471_v57 = vpop.f32.mrb[20].mxu1 }
0x14a3   :  { %v1872_v59 = vmul.f32 0.35355338, %v3471_v57  ;;  %v1862_v54 = vpop.f32.mrb[21].mxu1 }
0x14a4   :  { %v1871_v34 = vmul.f32 0.35355338, %v1862_v54 }
0x14a5   :  { %v1874_v63 = vadd.f32 %v1872_v59, %v4312_v43 }
0x14a6   :  { %v1873_v0 = vadd.f32 %v1871_v34, %v4316_v46 }
0x14a7   :  { %v1878_v6 = vsel %vm369_vm6, %v1874_v63, -inf }
0x14a8   :  { %1879 = vmax.xlane.f32.xlu1 %v1878_v6  ;;  %v1875_v9 = vsel %vm365_vm5, %v1873_v0, -inf }
0x14a9   :  { %1876 = vmax.xlane.f32.xlu0 %v1875_v9 }
0x14ad   :  { %2081 = vmax.xlane.f32.xlu0 %v2080_v11 }
0x14b1   :  { %2084 = vmax.xlane.f32.xlu0 %v2083_v2 }
0x1535   :  { %v1880_v33 = vpop.xlane.xlu1 %1879 }
0x1536   :  { %v1877_v3 = vpop.xlane.xlu0 %1876  ;;  %v1882_v12 = vsub.f32 %v1874_v63, %v1880_v33 }
0x1537   :  { %v1881_v4 = vsub.f32 %v1873_v0, %v1877_v3 }
0x1538   :  { %v1885_v20 = vmul.f32 1.442695, %v1882_v12 }
0x1539   :  { %v1883_v13 = vmul.f32 1.442695, %v1881_v4 }
0x153a   :  { %v2082_v5 = vpop.xlane.xlu0 %2081 }
0x153b   :  { %v2086_v10 = vsub.f32 %v2078_v8, %v2082_v5 }
0x153d   :  { %v2088_v17 = vmul.f32 1.442695, %v2086_v10 }
0x153e   :  { %v2085_v18 = vpop.xlane.xlu0 %2084 }
0x153f   :  { %4017 = vpow2.f32 %v2088_v17  ;;  %v2087_v19 = vsub.f32 %v2079_v1, %v2085_v18 }
0x1540   :  { %4019 = vpow2.f32 %v1883_v13  ;;  %v3956_v13 = vpack.i.bf16 %v4561_v36, %v4556_v35 }
0x1541   :  { %v2090_v21 = vmul.f32 1.442695, %v2087_v19 }
0x1543   :  { %4021 = vpow2.f32 %v2090_v21 }
0x1544   :  { %4023 = vpow2.f32 %v1885_v20 }
0x1549   :  { %v4018_v22 = vpop.eup %4017 }
0x154a   :  { %v2092_v51 = vsel %vm365_vm5, %v4018_v22, 0.0  ;;  %v4020_v31 = vpop.eup %4019 }
0x154b   :  { %2093 = vadd.xlane.f32.xlu0 %v2092_v51  ;;  %v1887_v26 = vsel %vm365_vm5, %v4020_v31, 0.0 }
0x154d   :  { %v4022_v25 = vpop.eup %4021 }
0x154e   :  { %v2095_v27 = vsel %vm369_vm6, %v4022_v25, 0.0  ;;  %v4024_v28 = vpop.eup %4023 }
0x154f   :  { %1888 = vadd.xlane.f32.xlu0 %v1887_v26  ;;  %2096 = vadd.xlane.f32.xlu1 %v2095_v27  ;;  %v1890_v32 = vsel %vm369_vm6, %v4024_v28, 0.0  ;;  %v3951_v26 = vpack.i.bf16 %v4549_v30, %v4544_v29 }
0x1553   :  { %1891 = vadd.xlane.f32.xlu1 %v1890_v32 }
0x1564   :  { %3937 = vrot.lane.b32.xlu1 %v4584_v61, %s4068_s13 }
0x1565   :  { %3932 = vrot.lane.b32.xlu0 %v4584_v61, %s4062_s9 }
0x1568   :  { %3942 = vrot.lane.b32.xlu1 %v4584_v61, %s4063_s10 }
0x1569   :  { %2192 = vrot.lane.b32.xlu0 %v4576_v58, %s4065_s1 }
0x156c   :  { %2190 = vrot.lane.b32.xlu1 %v4578_v60, %s4065_s1 }
0x15d8   :  { %v2094_v37 = vpop.xlane.xlu0 %2093 }
0x15dc   :  { %v2097_v39 = vpop.xlane.xlu1 %2096  ;;  %v1889_v40 = vpop.xlane.xlu0 %1888 }
0x15dd   :  { %4025 = vrcp.f32 %v1889_v40 }
0x15de   :  { %4027 = vrcp.f32 %v2094_v37 }
0x15e0   :  { %v1892_v41 = vpop.xlane.xlu1 %1891  ;;  %v3933_v42 = vpop.permute.xlu0 %3932 }
0x15e1   :  { %4029 = vrcp.f32 %v1892_v41  ;;  %v3935_v44 = vunpack.i.h.bf16 %v3933_v42  ;;  %v3934_v45 = vunpack.i.l.bf16 %v3933_v42 }
0x15e2   :  { %4031 = vrcp.f32 %v2097_v39 }
0x15e3   :  { %v3726_v47 = vpack.c.bf16 %v3935_v44, %v3934_v45 }
0x15e4   :  { %v3938_v48 = vpop.permute.xlu1 %3937  ;;  %v2193_v7 = vpop.permute.xlu0 %2192 }
0x15e5   :  { %v3940_v24 = vunpack.i.h.bf16 %v3938_v48  ;;  %v3939_v23 = vunpack.i.l.bf16 %v3938_v48  ;;  %3728 = vmatprep.subr.msk.bf16.mxu1 %vm4327_vm8, %v3726_v47 }
0x15e6   :  { %3731 = vmatpush3.bf16.msk.msra.mxu1 %vm4327_vm8, %v3726_v47 }
0x15e7   :  { %v3738_v58 = vpack.c.bf16 %v3940_v24, %v3939_v23  ;;  %v4026_v60 = vpop.eup %4025 }
0x15e8   :  { %v3943_v49 = vpop.permute.xlu1 %3942  ;;  %v1895_v50 = vmul.f32 %v4026_v60, %v4020_v31  ;;  %v4028_v52 = vpop.eup %4027 }
0x15e9   :  { %3740 = vmatprep.subr.msk.bf16.mxu1 %vm4327_vm8, %v3738_v58  ;;  %v3945_v53 = vunpack.i.h.bf16 %v3943_v49  ;;  %v3944_v57 = vunpack.i.l.bf16 %v3943_v49  ;;  %v2100_v34 = vmul.f32 %v4028_v52, %v4018_v22 }
0x15ea   :  { %3476 = vmatprep.mubr.msk.f32.mxu1 %vm365_vm5, %v1895_v50 }
0x15eb   :  { %v4030_v59 = vpop.eup %4029  ;;  %v3744_v63 = vpack.c.bf16 %v3945_v53, %v3944_v57 }
0x15ec   :  { %v1896_v54 = vmul.f32 %v4030_v59, %v4024_v28  ;;  %v4032_v62 = vpop.eup %4031  ;;  %v2191_v6 = vpop.permute.xlu1 %2190 }
0x15ed   :  { %v2101_v0 = vmul.f32 %v4032_v62, %v4022_v25 }
0x15ee   :  { %3477 = vmatmul.mubr.msk.f32.vlgmr.msra.gmra.mrb[22].mxu1 %vm365_vm5, %v1896_v54 }
0x15ef   :  { %3743 = vmatpush3.bf16.msk.msra.mxu1 %vm4327_vm8, %v3738_v58  ;;  %3490 = vmatprep.mubr.msk.f32.mxu1 %vm365_vm5, %v2100_v34 }
0x15f0   :  { %3746 = vmatprep.subr.msk.bf16.mxu1 %vm4296_vm3, %v3744_v63 }
0x15f2   :  { %3491 = vmatmul.mubr.msk.f32.vlgmr.msra.gmra.mrb[24].mxu1 %vm365_vm5, %v2101_v0 }
0x15f3   :  { %3497 = vmatprep.mubr.msk.f32.mxu1 %vm269_vm2, %v2191_v6 }
0x15f8   :  { %3749 = vmatpush3.bf16.xpose.msk.msra.mxu1 %vm4296_vm3, %v3744_v63 }
0x15ff   :  { %3498 = vmatmul.mubr.msk.f32.vlgmr.msra.gmra.mrb[26].mxu1 %vm269_vm2, %v2193_v7 }
0x16c1   :  { %v3478_v9 = vpop.f32.mrb[22].mxu1 }
0x16c2   :  { %v1976_v8 = vpop.f32.mrb[23].mxu1 }
0x16c5   :  { %v3492_v11 = vpop.f32.mrb[24].mxu1 }
0x16c6   :  { %v2181_v1 = vpop.f32.mrb[25].mxu1 }
0x16d2   :  { %v3499_v2 = vpop.f32.mrb[26].mxu1 }
0x16d3   :  { %v2282_v3 = vmul.f32 0.35355338, %v3499_v2  ;;  %v2272_v4 = vpop.f32.mrb[27].mxu1 }
0x16d4   :  { %v2281_v33 = vmul.f32 0.35355338, %v2272_v4 }
0x16d5   :  { %v2284_v5 = vadd.f32 %v2282_v3, %v4312_v43 }
0x16d6   :  { %v2283_v10 = vadd.f32 %v2281_v33, %v4316_v46 }
0x16d7   :  { %v2288_v12 = vsel %vm369_vm6, %v2284_v5, -inf }
0x16d8   :  { %2289 = vmax.xlane.f32.xlu0 %v2288_v12  ;;  %v2285_v38 = vsel %vm365_vm5, %v2283_v10, -inf }
0x16d9   :  { %2286 = vmax.xlane.f32.xlu1 %v2285_v38  ;;  %v3115_v38 = vld [vmem:[%s4959_s3 + $0x20] sm:$0xff] }
0x16ea   :  { %3947 = vrot.lane.b32.xlu1 %v4584_v61, %s4067_s12 }
0x16ee   :  { %3957 = vrot.lane.b32.xlu1 %v3956_v13, %s4069_s14  ;;  %v3116_v13 = vld [vmem:[%s4959_s3 + $0x28] sm:$0xff] }
0x16f2   :  { %2397 = vrot.lane.b32.xlu1 %v1976_v8, %s4070_s15 }
0x16f6   :  { %2399 = vrot.lane.b32.xlu1 %v3478_v9, %s4070_s15 }
0x16fa   :  { %2407 = vrot.lane.b32.xlu1 %v3492_v11, %s4071_s16 }
0x1765   :  { %v2290_v43 = vpop.xlane.xlu0 %2289 }
0x1766   :  { %v2292_v46 = vsub.f32 %v2284_v5, %v2290_v43  ;;  %v2287_v17 = vpop.xlane.xlu1 %2286  ;;  %v3764_v43 = vpack.c.bf16 %v3116_v13, %v3115_v38 }
0x1767   :  { %v2291_v18 = vsub.f32 %v2283_v10, %v2287_v17  ;;  %v3118_v17 = vld [vmem:[%s4959_s3 + $0x38] sm:$0xff] }
0x1768   :  { %v2295_v19 = vmul.f32 1.442695, %v2292_v46  ;;  %3765 = vmatprep.subr.bf16.mxu1 %v3764_v43  ;;  %v3117_v46 = vld [vmem:[%s4959_s3 + $0x30] sm:$0xff] }
0x1769   :  { %v2293_v20 = vmul.f32 1.442695, %v2291_v18  ;;  %3767 = vmatpush3.bf16.msra.mxu1 %v3764_v43  ;;  %v3768_v18 = vpack.c.bf16 %v3118_v17, %v3117_v46 }
0x176a   :  { %v3948_v21 = vpop.permute.xlu1 %3947 }
0x176b   :  { %4033 = vpow2.f32 %v2293_v20  ;;  %v3950_v61 = vunpack.i.h.bf16 %v3948_v21  ;;  %v3949_v22 = vunpack.i.l.bf16 %v3948_v21  ;;  %3769 = vmatprep.subr.bf16.mxu1 %v3768_v18 }
0x176c   :  { %4035 = vpow2.f32 %v2295_v19 }
0x176d   :  { %v3750_v35 = vpack.c.bf16 %v3950_v61, %v3949_v22  ;;  %3771 = vmatpush3.bf16.msra.mxu1 %v3768_v18 }
0x176e   :  { %v3958_v40 = vpop.permute.xlu1 %3957 }
0x176f   :  { %3752 = vmatprep.subr.msk.bf16.mxu0 %vm4327_vm8, %v3750_v35  ;;  %v3960_v42 = vunpack.i.h.bf16 %v3958_v40  ;;  %v3959_v44 = vunpack.i.l.bf16 %v3958_v40  ;;  %v3122_v40 = vld [vmem:[%s4960_s4 + $0x88] sm:$0xff] }
0x1770   :  { %3755 = vmatpush3.bf16.msk.msra.mxu0 %vm4327_vm8, %v3750_v35 }
0x1771   :  { %v3760_v30 = vpack.c.bf16 %v3960_v42, %v3959_v44  ;;  %v3123_v42 = vld [vmem:[%s4960_s4 + $0x90] sm:$0xff]  ;;  %v3124_v44 = vld [vmem:[%s4960_s4 + $0x98] sm:$0xff] }
0x1772   :  { %v2398_v23 = vpop.permute.xlu1 %2397 }
0x1773   :  { %v2419_v50 = vsel %vm269_vm2, %v4634_v56, %v2398_v23  ;;  %v2524_v56 = vld [vmem:[%s4958_s7 + $0x13] ss:$0 sm:$0xff] }
0x1775   :  { %v4034_v36 = vpop.eup %4033 }
0x1776   :  { %v2297_v51 = vsel %vm365_vm5, %v4034_v36, 0.0  ;;  %v4036_v31 = vpop.eup %4035  ;;  %v2400_v58 = vpop.permute.xlu1 %2399 }
0x1777   :  { %2298 = vadd.xlane.f32.xlu0 %v2297_v51  ;;  %v2300_v25 = vsel %vm369_vm6, %v4036_v31, 0.0  ;;  %v2420_v53 = vsel %vm269_vm2, %v4632_v55, %v2400_v58  ;;  %v2527_v51 = vld [vmem:[%s4958_s7 + $0x14] ss:$0 sm:$0xff]  ;;  %v3129_v58 = vld [vmem:[%s4960_s4 + $0xc0] sm:$0xff] }
0x177a   :  { %v2408_v60 = vpop.permute.xlu1 %2407 }
0x177b   :  { %2301 = vadd.xlane.f32.xlu0 %v2300_v25  ;;  %v2422_v54 = vsel %vm1118_vm9, %v2420_v53, %v2408_v60  ;;  %v2528_v25 = vld [vmem:[%s4958_s7 + $0x15] ss:$0 sm:$0xff]  ;;  %v3130_v60 = vld [vmem:[%s4960_s4 + $0xc8] sm:$0xff] }
0x1791   :  { %3952 = vrot.lane.b32.xlu0 %v3951_v26, %s4069_s14 }
0x1795   :  { %2405 = vrot.lane.b32.xlu0 %v2181_v1, %s4071_s16 }
0x1804   :  { %v2299_v27 = vpop.xlane.xlu0 %2298 }
0x1805   :  { %4037 = vrcp.f32 %v2299_v27 }
0x1808   :  { %v2302_v28 = vpop.xlane.xlu0 %2301 }
0x1809   :  { %4039 = vrcp.f32 %v2302_v28 }
0x180c   :  { %v3953_v14 = vpop.permute.xlu0 %3952 }
0x180d   :  { %v3955_v32 = vunpack.i.h.bf16 %v3953_v14  ;;  %v3954_v37 = vunpack.i.l.bf16 %v3953_v14 }
0x180f   :  { %v4038_v39 = vpop.eup %4037  ;;  %v3756_v41 = vpack.c.bf16 %v3955_v32, %v3954_v37 }
0x1810   :  { %v2305_v45 = vmul.f32 %v4038_v39, %v4034_v36  ;;  %v2406_v49 = vpop.permute.xlu0 %2405  ;;  %v3121_v39 = vld [vmem:[%s4960_s4 + $0x80] sm:$0xff] }
0x1811   :  { %3757 = vmatprep.subr.bf16.mxu0 %v3756_v41  ;;  %v2421_v57 = vsel %vm1118_vm9, %v2419_v50, %v2406_v49  ;;  %v3131_v49 = vld [vmem:[%s4960_s4 + $0xd0] sm:$0xff]  ;;  %v3788_v50 = vpack.c.bf16 %v3130_v60, %v3129_v58  ;;  %v2800_v58 = vld [vmem:[%s4961_s5 + $0x18] sm:$0xff]  ;;  %v2797_v60 = vld [vmem:[%s4961_s5] sm:$0xff] }
0x1812   :  { %3504 = vmatprep.mubr.msk.f32.mxu0 %vm365_vm5, %v2305_v45  ;;  %v3776_v45 = vpack.c.bf16 %v3124_v44, %v3123_v42 }
0x1813   :  { %v4040_v29 = vpop.eup %4039 }
0x1814   :  { %v2306_v47 = vmul.f32 %v4040_v29, %v4036_v31  ;;  %v3125_v29 = vld [vmem:[%s4960_s4 + $0xa0] sm:$0xff] }
0x1816   :  { %3505 = vmatmul.mubr.msk.f32.vlgmr.msra.gmra.mrb[16].mxu0 %vm365_vm5, %v2306_v47 }
0x1817   :  { %3759 = vmatpush3.bf16.msra.mxu0 %v3756_v41  ;;  %v3772_v41 = vpack.c.bf16 %v3122_v40, %v3121_v39 }
0x1818   :  { %3761 = vmatprep.subr.bf16.mxu0 %v3760_v30 }
0x181b   :  { %3763 = vmatpush3.bf16.msra.mxu0 %v3760_v30  ;;  %v3126_v30 = vld [vmem:[%s4960_s4 + $0xa8] sm:$0xff] }
0x181c   :  { %3773 = vmatprep.subr.bf16.mxu0 %v3772_v41  ;;  %v3780_v47 = vpack.c.bf16 %v3126_v30, %v3125_v29 }
0x18e9   :  { %v3506_v48 = vpop.f32.mrb[16].mxu0 }
0x18ea   :  { %2415 = vrot.lane.b32.xlu1 %v3506_v48, %s4970_s23  ;;  %v2386_v24 = vpop.f32.mrb[17].mxu0  ;;  %v3127_v48 = vld [vmem:[%s4960_s4 + $0xb0] sm:$0xff] }
0x18eb   :  { %2413 = vrot.lane.b32.xlu0 %v2386_v24, %s4970_s23  ;;  %v3128_v24 = vld [vmem:[%s4960_s4 + $0xb8] sm:$0xff] }
0x18ec   :  { %v3784_v23 = vpack.c.bf16 %v3128_v24, %v3127_v48 }
0x195c   :  { %v2416_v52 = vpop.permute.xlu1 %2415 }
0x195d   :  { %v2414_v59 = vpop.permute.xlu0 %2413  ;;  %v2424_v34 = vsel %vm1121_vm10, %v2422_v54, %v2416_v52  ;;  %v3132_v52 = vld [vmem:[%s4960_s4 + $0xd8] sm:$0xff] }
0x195e   :  { %v2423_v62 = vsel %vm1121_vm10, %v2421_v57, %v2414_v59  ;;  %v3792_v53 = vpack.c.bf16 %v3132_v52, %v3131_v49  ;;  %v3133_v57 = vld [vmem:[%s4960_s4 + $0xe0] sm:$0xff]  ;;  %v3134_v59 = vld [vmem:[%s4960_s4 + $0xe8] sm:$0xff]  ;;  %v4073_v49 = vmov 0.0   ;;  %v2799_v52 = vld [vmem:[%s4961_s5 + $0x10] sm:$0xff] }
0x195f   :  { %3515 = vmatprep.mubr.msk.f32.mxu0 %vm148_vm0, %v2423_v62  ;;  %v3796_v54 = vpack.c.bf16 %v3134_v59, %v3133_v57  ;;  %v3135_v62 = vld [vmem:[%s4960_s4 + $0xf0] sm:$0xff]  ;;  %v2804_v57 = vld [vmem:[%s4961_s5 + $0x38] sm:$0xff]  ;;  %v3806_v59 = vpack.c.bf16 %v2799_v52, %v2797_v60 }
0x1960   :  { %3516 = vmatmul.mubr.msk.f32.vlgmr.msra.gmra.mrb[18].mxu0 %vm148_vm0, %v2424_v34  ;;  %v3136_v34 = vld [vmem:[%s4960_s4 + $0xf8] sm:$0xff]  ;;  %v2930_v52 = vld [vmem:[%s4962_s6 + $0xf0] sm:$0xff] }
0x1961   :  { %3775 = vmatpush3.bf16.msra.mxu0 %v3772_v41  ;;  %v2764_v41 = vld [vmem:[%s4958_s7 + $0x21] ss:$0 sm:$0xff]  ;;  %v2931_v60 = vld [vmem:[%s4962_s6 + $0xf8] sm:$0xff] }
0x1962   :  { %3777 = vmatprep.subr.bf16.mxu0 %v3776_v45 }
0x1965   :  { %3779 = vmatpush3.bf16.msra.mxu0 %v3776_v45 }
0x1966   :  { %3781 = vmatprep.subr.bf16.mxu0 %v3780_v47 }
0x1969   :  { %3783 = vmatpush3.bf16.msra.mxu0 %v3780_v47 }
0x196a   :  { %3785 = vmatprep.subr.bf16.mxu0 %v3784_v23 }
0x196d   :  { %3787 = vmatpush3.bf16.msra.mxu0 %v3784_v23  ;;  %v2798_v23 = vld [vmem:[%s4961_s5 + $0x8] sm:$0xff] }
0x196e   :  { %3789 = vmatprep.subr.bf16.mxu0 %v3788_v50 }
0x1971   :  { %3791 = vmatpush3.bf16.msra.mxu0 %v3788_v50  ;;  %v3804_v50 = vpack.c.bf16 %v2800_v58, %v2798_v23  ;;  %v2929_v58 = vld [vmem:[%s4962_s6 + $0xe8] sm:$0xff] }
0x1972   :  { %3793 = vmatprep.subr.bf16.mxu0 %v3792_v53 }
0x1973   :  { %3805 = vmatprep.subr.bf16.mxu1 %v3804_v50  ;;  %v2928_v50 = vld [vmem:[%s4962_s6 + $0xe0] sm:$0xff] }
0x1975   :  { %3795 = vmatpush3.bf16.msra.mxu0 %v3792_v53  ;;  %v2802_v53 = vld [vmem:[%s4961_s5 + $0x28] sm:$0xff] }
0x1976   :  { %3797 = vmatprep.subr.bf16.mxu0 %v3796_v54 }
0x1979   :  { %3799 = vmatpush3.bf16.msra.mxu0 %v3796_v54  ;;  %v3808_v54 = vpack.c.bf16 %v2804_v57, %v2802_v53  ;;  %v3842_v53 = vpack.c.bf16 %v2930_v52, %v2928_v50  ;;  %v2808_v57 = vlaneseq }
0x1a33   :  { %v3517_v63 = vpop.f32.mrb[18].mxu0 }
0x1a34   :  { %v2523_v55 = vadd.f32 %v3517_v63, %v4529_v15  ;;  %v2513_v0 = vpop.f32.mrb[19].mxu0  ;;  %v3800_v63 = vpack.c.bf16 %v3136_v34, %v3135_v62  ;;  %v2801_v62 = vld [vmem:[%s4961_s5 + $0x20] sm:$0xff]  ;;  %v2803_v34 = vld [vmem:[%s4961_s5 + $0x30] sm:$0xff] }
0x1a35   :  { %v2522_v6 = vadd.f32 %v2513_v0, %v4531_v16 }
0x1a36   :  { %v2526_v7 = vadd.f32 %v2524_v56, %v2523_v55  ;;  %3801 = vmatprep.subr.bf16.mxu0 %v3800_v63 }
0x1a37   :  { %v4717_v9 = vadd.f32 %v2524_v56, %v2522_v6  ;;  %3803 = vmatpush3.bf16.msra.mxu0 %v3800_v63  ;;  %v2564_v56 = vld [vmem:[%s4958_s7 + $0x16] ss:$0 sm:$0xff]  ;;  %v3810_v63 = vpack.c.bf16 %v2803_v34, %v2801_v62  ;;  %v3137_v62 = vld [vmem:[%s4958_s7 + $0x24] ss:$8 sm:$0x3] }
0x1a38   :  { %v2532_v8 = vsel %vm152_vm1, %v2526_v7, 0.0 }
0x1a39   :  { %2533 = vadd.xlane.f32.xlu1 %v2532_v8  ;;  %v2529_v11 = vsel %vm148_vm0, %v4717_v9, 0.0 }
0x1a3a   :  { %2530 = vadd.xlane.f32.xlu0 %v2529_v11 }
0x1ac6   :  { %v2534_v1 = vpop.xlane.xlu1 %2533 }
0x1ac7   :  { %v2536_v2 = vmul.f32 0.03125, %v2534_v1  ;;  %v2531_v3 = vpop.xlane.xlu0 %2530 }
0x1ac8   :  { %v2535_v4 = vmul.f32 0.03125, %v2531_v3 }
0x1ac9   :  { %v2538_v33 = vsub.f32 %v2526_v7, %v2536_v2 }
0x1aca   :  { %v2537_v15 = vsub.f32 %v4717_v9, %v2535_v4 }
0x1acb   :  { %v2540_v10 = vmul.f32 %v2538_v33, %v2538_v33 }
0x1acc   :  { %v2539_v5 = vmul.f32 %v2537_v15, %v2537_v15 }
0x1acd   :  { %v2544_v12 = vsel %vm152_vm1, %v2540_v10, 0.0 }
0x1ace   :  { %v2541_v16 = vsel %vm148_vm0, %v2539_v5, 0.0 }
0x1acf   :  { %2542 = vadd.xlane.f32.xlu0 %v2541_v16 }
0x1ad3   :  { %2545 = vadd.xlane.f32.xlu0 %v2544_v12 }
0x1b5c   :  { %v2543_v19 = vpop.xlane.xlu0 %2542 }
0x1b5d   :  { %v2547_v20 = vmul.f32 0.03125, %v2543_v19 }
0x1b5f   :  { %v2549_v21 = vadd.f32 1e-12, %v2547_v20 }
0x1b60   :  { %v2546_v61 = vpop.xlane.xlu0 %2545 }
0x1b61   :  { %4041 = vrsqrt.f32 %v2549_v21  ;;  %v2548_v22 = vmul.f32 0.03125, %v2546_v61  ;;  %v2756_v21 = vld [vmem:[%s4958_s7 + $0x17] ss:$0 sm:$0xff] }
0x1b63   :  { %v2550_v35 = vadd.f32 1e-12, %v2548_v22 }
0x1b65   :  { %4043 = vrsqrt.f32 %v2550_v35 }
0x1b6b   :  { %v4042_v36 = vpop.eup %4041 }
0x1b6c   :  { %v2553_v31 = vmul.f32 %v4042_v36, %v2537_v15 }
0x1b6e   :  { %v2555_v26 = vmul.f32 %v2553_v31, %v2527_v51 }
0x1b6f   :  { %v4044_v27 = vpop.eup %4043 }
0x1b70   :  { %v2554_v28 = vmul.f32 %v4044_v27, %v2538_v33  ;;  %v2557_v14 = vadd.f32 %v2555_v26, %v2528_v25 }
0x1b72   :  { %v2556_v32 = vmul.f32 %v2554_v28, %v2527_v51  ;;  %3526 = vmatprep.mubr.msk.f32.mxu1 %vm148_vm0, %v2557_v14 }
0x1b74   :  { %v2558_v37 = vadd.f32 %v2556_v32, %v2528_v25 }
0x1b76   :  { %3527 = vmatmul.mubr.msk.f32.vlgmr.msra.gmra.mrb[28].mxu1 %vm148_vm0, %v2558_v37 }
0x1b77   :  { %2885 = vmatprep.mubr.f32.mxu1 %v4073_v49  ;;  %3807 = vmatpush1.bf16.msra.mxu1 %v3806_v59  ;;  %v2809_v59 = vshrl.u32 %v2808_v57, 7 }
0x1b78   :  { %3809 = vmatprep.subr.bf16.mxu1 %v3808_v54 }
0x1b79   :  { %v2810_v54 = vsub.s32 0, %v2809_v59 }
0x1b7b   :  { %3811 = vmatpush1.bf16.msra.mxu1 %v3810_v63  ;;  %v2811_v34 = vrot.slane %v3137_v62, %v2810_v54 }
0x1c49   :  { %v3528_v55 = vpop.f32.mrb[28].mxu1 }
0x1c4a   :  { %v2643_v0 = vadd.f32 %v3528_v55, %v2564_v56  ;;  %v2637_v6 = vpop.f32.mrb[29].mxu1 }
0x1c4b   :  { %v2638_v7 = vadd.f32 %v2637_v6, %v2564_v56 }
0x1c4c   :  { %v2647_v8 = vmul.f32 %v2643_v0, %v2643_v0 }
0x1c4d   :  { %v2646_v11 = vmul.f32 %v2638_v7, %v2638_v7 }
0x1c4e   :  { %v2649_v1 = vmul.f32 %v2647_v8, %v2643_v0 }
0x1c4f   :  { %v2648_v2 = vmul.f32 %v2646_v11, %v2638_v7  ;;  %v2781_v11 = vld [vmem:[%s4958_s7 + $0x23] ss:$0 sm:$0xff] }
0x1c50   :  { %v2651_v3 = vmul.f32 0.044715, %v2649_v1 }
0x1c51   :  { %v2650_v4 = vmul.f32 0.044715, %v2648_v2 }
0x1c52   :  { %v2653_v33 = vadd.f32 %v2651_v3, %v2643_v0  ;;  %v2901_v3 = vld [vmem:[%s4962_s6 + $0x8] sm:$0xff] }
0x1c53   :  { %v2652_v15 = vadd.f32 %v2650_v4, %v2638_v7  ;;  %v2903_v4 = vld [vmem:[%s4962_s6 + $0x18] sm:$0xff] }
0x1c54   :  { %v2655_v5 = vmul.f32 0.7978846, %v2653_v33  ;;  %v3812_v33 = vpack.c.bf16 %v2903_v4, %v2901_v3 }
0x1c55   :  { %v2654_v16 = vmul.f32 0.7978846, %v2652_v15  ;;  %v2900_v15 = vld [vmem:[%s4962_s6] sm:$0xff] }
0x1c56   :  { %4045 = vtanh.f32 %v2655_v5  ;;  %v2902_v5 = vld [vmem:[%s4962_s6 + $0x10] sm:$0xff]  ;;  %3813 = vmatprep.subr.bf16.mxu1 %v3812_v33  ;;  %v3140_v33 = vld [vmem:[%s4958_s7 + $0x25] ss:$8 sm:$0x3] }
0x1c57   :  { %4047 = vtanh.f32 %v2654_v16  ;;  %v3814_v16 = vpack.c.bf16 %v2902_v5, %v2900_v15  ;;  %v2938_v15 = vrot.slane %v3140_v33, %v2810_v54 }
0x1c60   :  { %v4046_v10 = vpop.eup %4045 }
0x1c61   :  { %v4048_v12 = vpop.eup %4047  ;;  %v2659_v38 = vadd.f32 1.0, %v4046_v10  ;;  %v2905_v10 = vld [vmem:[%s4962_s6 + $0x28] sm:$0xff] }
0x1c62   :  { %v2658_v13 = vadd.f32 1.0, %v4048_v12  ;;  %v2907_v12 = vld [vmem:[%s4962_s6 + $0x38] sm:$0xff] }
0x1c63   :  { %v2661_v43 = vmul.f32 0.5, %v2659_v38  ;;  %v3816_v38 = vpack.c.bf16 %v2907_v12, %v2905_v10 }
0x1c64   :  { %v2660_v46 = vmul.f32 0.5, %v2658_v13  ;;  %v2904_v13 = vld [vmem:[%s4962_s6 + $0x20] sm:$0xff] }
0x1c65   :  { %v2663_v18 = vmul.f32 %v2661_v43, %v2643_v0  ;;  %v2906_v43 = vld [vmem:[%s4962_s6 + $0x30] sm:$0xff] }
0x1c66   :  { %v2662_v17 = vmul.f32 %v2660_v46, %v2638_v7  ;;  %v2780_v7 = vld [vmem:[%s4958_s7 + $0x22] ss:$0 sm:$0xff]  ;;  %v3818_v46 = vpack.c.bf16 %v2906_v43, %v2904_v13 }
0x1c68   :  { %3561 = vmatprep.mubr.f32.mxu0 %v2662_v17  ;;  %v2909_v17 = vld [vmem:[%s4962_s6 + $0x48] sm:$0xff] }
0x1c69   :  { %3562 = vmatmul.mubr.f32.vlgmr.msra.gmra.mrb[20].mxu0 %v2663_v18  ;;  %v2911_v18 = vld [vmem:[%s4962_s6 + $0x58] sm:$0xff] }
0x1d3c   :  { %v3563_v19 = vpop.f32.mrb[20].mxu0 }
0x1d3d   :  { %v2747_v20 = vpop.f32.mrb[21].mxu0  ;;  %v3820_v19 = vpack.c.bf16 %v2911_v18, %v2909_v17 }
0x1d3e   :  { %v2755_v61 = vadd.f32 %v2747_v20, %v4717_v9  ;;  %v2763_v9 = vld [vmem:[%s4958_s7 + $0x20] ss:$0 sm:$0xff] }
0x1d3f   :  { %v2908_v20 = vld [vmem:[%s4962_s6 + $0x40] sm:$0xff] }
0x1d40   :  { %v2757_v22 = vadd.f32 %v2756_v21, %v2755_v61  ;;  %v2910_v21 = vld [vmem:[%s4962_s6 + $0x50] sm:$0xff] }
0x1d41   :  { %v3822_v61 = vpack.c.bf16 %v2910_v21, %v2908_v20 }
0x1d42   :  { %v2759_v35 = vrot.slane %v2757_v22, 4 }
0x1d44   :  { %v2762_v36 = vsel %vm2761_vm11, %v2757_v22, %v2759_v35  ;;  %v2913_v22 = vld [vmem:[%s4962_s6 + $0x68] sm:$0xff]  ;;  %v2915_v35 = vld [vmem:[%s4962_s6 + $0x78] sm:$0xff] }
0x1d45   :  { %v2765_v51 = vsel %vm152_vm1, %v2762_v36, 0.0 }
0x1d46   :  { %2766 = vadd.xlane.f32.xlu0 %v2765_v51  ;;  %v2912_v51 = vld [vmem:[%s4962_s6 + $0x60] sm:$0xff] }
0x1dd3   :  { %v2767_v31 = vpop.xlane.xlu0 %2766 }
0x1dd4   :  { %v2768_v25 = vmul.f32 0.03125, %v2767_v31  ;;  %v2914_v31 = vld [vmem:[%s4962_s6 + $0x70] sm:$0xff] }
0x1dd6   :  { %v2769_v26 = vsub.f32 %v2762_v36, %v2768_v25  ;;  %v3824_v36 = vpack.c.bf16 %v2915_v35, %v2913_v22  ;;  %v3826_v25 = vpack.c.bf16 %v2914_v31, %v2912_v51 }
0x1dd8   :  { %v2770_v27 = vmul.f32 %v2769_v26, %v2769_v26 }
0x1dda   :  { %v2771_v28 = vsel %vm152_vm1, %v2770_v27, 0.0  ;;  %v2919_v27 = vld [vmem:[%s4962_s6 + $0x98] sm:$0xff] }
0x1ddb   :  { %2772 = vadd.xlane.f32.xlu1 %v2771_v28 }
0x1e68   :  { %v2773_v14 = vpop.xlane.xlu1 %2772 }
0x1e69   :  { %v2774_v32 = vmul.f32 0.03125, %v2773_v14  ;;  %v2916_v14 = vld [vmem:[%s4962_s6 + $0x80] sm:$0xff] }
0x1e6b   :  { %v2775_v37 = vadd.f32 1e-12, %v2774_v32  ;;  %v2918_v32 = vld [vmem:[%s4962_s6 + $0x90] sm:$0xff] }
0x1e6d   :  { %4049 = vrsqrt.f32 %v2775_v37  ;;  %v3830_v37 = vpack.c.bf16 %v2918_v32, %v2916_v14 }
0x1e77   :  { %v4050_v39 = vpop.eup %4049 }
0x1e78   :  { %v2777_v40 = vmul.f32 %v4050_v39, %v2769_v26  ;;  %v2917_v26 = vld [vmem:[%s4962_s6 + $0x88] sm:$0xff] }
0x1e79   :  { %v3828_v28 = vpack.c.bf16 %v2919_v27, %v2917_v26  ;;  %v2921_v39 = vld [vmem:[%s4962_s6 + $0xa8] sm:$0xff] }
0x1e7a   :  { %v2778_v42 = vmul.f32 %v2777_v40, %v2763_v9  ;;  %v2923_v9 = vld [vmem:[%s4962_s6 + $0xb8] sm:$0xff] }
0x1e7b   :  { %v3832_v40 = vpack.c.bf16 %v2923_v9, %v2921_v39 }
0x1e7c   :  { %v4808_v44 = vadd.f32 %v2778_v42, %v2764_v41  ;;  %v2920_v41 = vld [vmem:[%s4962_s6 + $0xa0] sm:$0xff]  ;;  %v2922_v42 = vld [vmem:[%s4962_s6 + $0xb0] sm:$0xff] }
0x1e7e   :  { %v2782_v45 = vsel %vm152_vm1, %v4808_v44, 0.0 }
0x1e7f   :  { %2783 = vadd.xlane.f32.xlu0 %v2782_v45  ;;  %v3834_v45 = vpack.c.bf16 %v2922_v42, %v2920_v41 }
0x1f0c   :  { %v2784_v29 = vpop.xlane.xlu0 %2783 }
0x1f0d   :  { %v2785_v30 = vmul.f32 0.03125, %v2784_v29  ;;  %v2925_v29 = vld [vmem:[%s4962_s6 + $0xc8] sm:$0xff] }
0x1f0f   :  { %v2786_v47 = vsub.f32 %v4808_v44, %v2785_v30  ;;  %v2927_v30 = vld [vmem:[%s4962_s6 + $0xd8] sm:$0xff] }
0x1f11   :  { %v2787_v48 = vmul.f32 %v2786_v47, %v2786_v47 }
0x1f13   :  { %v2788_v24 = vsel %vm152_vm1, %v2787_v48, 0.0  ;;  %v2924_v48 = vld [vmem:[%s4962_s6 + $0xc0] sm:$0xff] }
0x1f14   :  { %2789 = vadd.xlane.f32.xlu1 %v2788_v24  ;;  %v2926_v24 = vld [vmem:[%s4962_s6 + $0xd0] sm:$0xff] }
0x1f15   :  { %v3838_v23 = vpack.c.bf16 %v2926_v24, %v2924_v48 }
0x1fa1   :  { %v2790_v56 = vpop.xlane.xlu1 %2789 }
0x1fa2   :  { %v2791_v55 = vmul.f32 0.03125, %v2790_v56 }
0x1fa4   :  { %v2792_v0 = vadd.f32 1e-05, %v2791_v55 }
0x1fa6   :  { %4051 = vrsqrt.f32 %v2792_v0 }
0x1fb0   :  { %v4052_v6 = vpop.eup %4051 }
0x1fb1   :  { %v2794_v8 = vmul.f32 %v4052_v6, %v2786_v47  ;;  %v3836_v47 = vpack.c.bf16 %v2927_v30, %v2925_v29 }
0x1fb3   :  { %v2795_v1 = vmul.f32 %v2794_v8, %v2780_v7  ;;  %v2814_v8 = vsub.s32 1, %v2809_v59 }
0x1fb5   :  { %v2796_v2 = vadd.f32 %v2795_v1, %v2781_v11  ;;  %v2815_v11 = vrot.slane %v3137_v62, %v2814_v8  ;;  %v2942_v10 = vrot.slane %v3140_v33, %v2814_v8 }
0x1fb7   :  { %3016 = vrot.lane.b32.xlu0 %v2796_v2, %s4069_s14  ;;  %3138 = vmatmul.mubr.msk.f32.vlgmr.msra.gmra.mrb[30].mxu1 %vm148_vm0, %v2796_v2 }
0x1fb8   :  { %3009 = vmatprep.mubr.f32.mxu1 %v4073_v49  ;;  %3815 = vmatpush1.bf16.msra.mxu1 %v3814_v16  ;;  %v3840_v49 = vpack.c.bf16 %v2931_v60, %v2929_v58 }
0x1fb9   :  { %3817 = vmatprep.subr.bf16.mxu1 %v3816_v38 }
0x1fbc   :  { %3819 = vmatpush1.bf16.msra.mxu1 %v3818_v46 }
0x1fbd   :  { %3821 = vmatprep.subr.bf16.mxu1 %v3820_v19 }
0x1fc0   :  { %3823 = vmatpush1.bf16.msra.mxu1 %v3822_v61 }
0x1fc1   :  { %3825 = vmatprep.subr.bf16.mxu1 %v3824_v36 }
0x1fc4   :  { %3827 = vmatpush1.bf16.msra.mxu1 %v3826_v25 }
0x1fc5   :  { %3829 = vmatprep.subr.bf16.mxu1 %v3828_v28 }
0x1fc8   :  { %3831 = vmatpush1.bf16.msra.mxu1 %v3830_v37 }
0x1fc9   :  { %3833 = vmatprep.subr.bf16.mxu1 %v3832_v40 }
0x1fcc   :  { %3835 = vmatpush1.bf16.msra.mxu1 %v3834_v45 }
0x1fcd   :  { %3837 = vmatprep.subr.bf16.mxu1 %v3836_v47 }
0x1fd0   :  { %3839 = vmatpush1.bf16.msra.mxu1 %v3838_v23 }
0x1fd1   :  { %3841 = vmatprep.subr.bf16.mxu1 %v3840_v49 }
0x1fd4   :  { %3843 = vmatpush1.bf16.msra.mxu1 %v3842_v53 }
0x2029   :  { %v3017_v43 = vpop.permute.xlu0 %3016 }
0x202a   :  { %v3028_v46 = vsel %vm148_vm0, %v4808_v44, %v3017_v43 }
0x208a   :  { %v2887_v63 = vpop.f32.mrb[30].mxu1 }
0x208b   :  { %v2888_v56 = vadd.f32 %v2887_v63, %v2811_v34  ;;  %v2889_v55 = vpop.f32.mrb[31].mxu1 }
0x208c   :  { %v2890_v3 = vadd.f32 %v2889_v55, %v2815_v11 }
0x208d   :  { %v3139_v0 = vmul.f32 -1.442695, %v2888_v56 }
0x208f   :  { %4053 = vpow2.f32 %v3139_v0 }
0x2099   :  { %v4054_v6 = vpop.eup %4053 }
0x209a   :  { %v2895_v7 = vadd.f32 1.0, %v4054_v6 }
0x209c   :  { %4055 = vrcp.f32 %v2895_v7 }
0x20a6   :  { %v4056_v1 = vpop.eup %4055 }
0x20a7   :  { %v2898_v2 = vmul.f32 %v4056_v1, %v2888_v56 }
0x20a9   :  { %v2899_v4 = vmul.f32 %v2898_v2, %v2890_v3 }
0x20ab   :  { %3010 = vmatmul.mubr.f32.vlgmr.msra.gmra.mrb[32].mxu1 %v2899_v4 }
0x217e   :  { %v3011_v5 = vpop.f32.mrb[32].mxu1 }
0x217f   :  { %v3012_v16 = vadd.f32 %v3011_v5, %v2938_v15  ;;  %v3013_v12 = vpop.f32.mrb[33].mxu1 }
0x2180   :  { %v3014_v38 = vadd.f32 %v3013_v12, %v2942_v10 }
0x2181   :  { %3021 = vrot.lane.b32.xlu1 %v3012_v16, %s4060_s30 }
0x2185   :  { %3023 = vrot.lane.b32.xlu1 %v3014_v38, %s4060_s30 }
0x21f3   :  { %v3022_v13 = vpop.permute.xlu1 %3021 }
0x21f4   :  { %v3029_v18 = vsel %vm3025_vm12, %v3028_v46, %v3022_v13 }
0x21f7   :  { %v3024_v17 = vpop.permute.xlu1 %3023 }
0x21f8   :  { %v3026_v19 = vsel %vm3025_vm12, %v3022_v13, %v3024_v17 }
0x21f9   :  { %v3031_v20 = vcombine.low %v3029_v18, %v3026_v19 }
0x21fb   :  { %3141 = vst.sshfl [vmem:[%s4963_s8] sm:$0x33 pattern:$0x76325410] %v3031_v20 }

</bundles_post_ra>
